<compile_context>
chip_gen: v7x
topology: tpu7x:2x2x1
jax: 0.10.0
libtpu: 0.0.40
codegen_flags: <defaults>
</compile_context>

<pallas_src>
from functools import partial

import jax
import jax.numpy as jnp
from jax.experimental import pallas as pl
from jax.experimental.pallas import tpu as pltpu


# ---------------------------------------------------------------------------
# Fused kernel: embedding gather + stacked GRU (1 timestep) + decoder
# ---------------------------------------------------------------------------
def _fused_kernel(*refs, num_layers, hidden_dim, batch):
    L, H, B = num_layers, hidden_dim, batch

    tok_ref = refs[0]                       # (B,) int32, SMEM
    emb_ref = refs[1]                       # (V, E) f32, HBM (ANY)
    lrefs = refs[2:2 + 7 * L]               # per layer: w_ih_rz, w_hh_rz, w_in, w_hn, b_rz, b_in, b_hn
    decw_hbm = refs[2 + 7 * L]              # (H, V) bf16, HBM (ANY)
    decb_ref = refs[3 + 7 * L]              # (1, V) f32, VMEM
    h0_ref = refs[4 + 7 * L]                # (L, B, H) f32, VMEM (aliased with h_all output)
    logits_ref = refs[5 + 7 * L]            # (B, V) f32 output
    hall_ref = refs[6 + 7 * L]              # (L, B, H) f32 output
    x_vmem = refs[7 + 7 * L]                # (B, E) f32 scratch (gather target)
    decw_vmem = refs[8 + 7 * L]             # (H, V) bf16 scratch (decoder weight)
    gsems = refs[9 + 7 * L]                 # (B,) DMA sems (gather)
    dsem = refs[10 + 7 * L]                 # (1,) DMA sem  (decoder weight)

    # --- Launch all DMAs up front: B embedding rows + decoder weight tile. ---
    gather = [
        pltpu.make_async_copy(emb_ref.at[tok_ref[b]], x_vmem.at[b], gsems.at[b])
        for b in range(B)
    ]
    for c in gather:
        c.start()
    dec_cp = pltpu.make_async_copy(decw_hbm, decw_vmem, dsem.at[0])
    dec_cp.start()

    # --- Layer-0 h-side compute (x-independent) hides the gather latency. ---
    w_ih_rz0, w_hh_rz0, w_in0, w_hn0, b_rz0, b_in0, b_hn0 = lrefs[:7]
    h0 = h0_ref[0]                          # (B, H) f32
    h0_bf = h0.astype(jnp.bfloat16)
    h_rz0 = jnp.dot(h0_bf, w_hh_rz0[...], preferred_element_type=jnp.float32)
    h_n0 = jnp.dot(h0_bf, w_hn0[...], preferred_element_type=jnp.float32)

    # --- Gather done: read x and run the stacked GRU (gate order r, z, n). ---
    for c in gather:
        c.wait()
    x = x_vmem[...]                         # (B, E) f32

    for l in range(L):
        w_ih_rz, w_hh_rz, w_in, w_hn, b_rz, b_in, b_hn = lrefs[7 * l:7 * l + 7]
        x_bf = x.astype(jnp.bfloat16)
        if l == 0:
            h, h_rz, h_n = h0, h_rz0, h_n0
        else:
            h = h0_ref[l]
            h_bf = h.astype(jnp.bfloat16)
            h_rz = jnp.dot(h_bf, w_hh_rz[...], preferred_element_type=jnp.float32)
            h_n = jnp.dot(h_bf, w_hn[...], preferred_element_type=jnp.float32)

        rz = jax.nn.sigmoid(
            jnp.dot(x_bf, w_ih_rz[...], preferred_element_type=jnp.float32)
            + h_rz + b_rz[...])
        r = rz[:, :H]
        z = rz[:, H:]
        i_n = jnp.dot(x_bf, w_in[...], preferred_element_type=jnp.float32) + b_in[...]
        n = jnp.tanh(i_n + r * (h_n + b_hn[...]))
        x = (1.0 - z) * n + z * h           # new hidden for this layer, f32
        hall_ref[l] = x

    # --- Decoder: logits = h_top @ dec_w_t + dec_b (weight DMA hidden behind GRU). ---
    dec_cp.wait()
    logits_ref[...] = (
        jnp.dot(x.astype(jnp.bfloat16), decw_vmem[...],
                preferred_element_type=jnp.float32) + decb_ref[...])


# ---------------------------------------------------------------------------
# Parameters
# ---------------------------------------------------------------------------
def init_params(key, vocab_size, embed_dim, hidden_dim, num_layers=3):
    """Deterministic synthetic parameters in PyTorch layout (gate order r, z, n)."""
    keys = jax.random.split(key, 4 + 4 * num_layers)
    scale = 0.05
    params = {
        "embedding": scale * jax.random.normal(keys[0], (vocab_size, embed_dim), jnp.float32),
        "dec_w": scale * jax.random.normal(keys[1], (vocab_size, hidden_dim), jnp.float32),
        "dec_b": scale * jax.random.normal(keys[2], (vocab_size,), jnp.float32),
        "w_ih": [], "w_hh": [], "b_ih": [], "b_hh": [],
    }
    for l in range(num_layers):
        in_dim = embed_dim if l == 0 else hidden_dim
        k = keys[4 + 4 * l: 8 + 4 * l]
        params["w_ih"].append(scale * jax.random.normal(k[0], (3 * hidden_dim, in_dim), jnp.float32))
        params["w_hh"].append(scale * jax.random.normal(k[1], (3 * hidden_dim, hidden_dim), jnp.float32))
        params["b_ih"].append(scale * jax.random.normal(k[2], (3 * hidden_dim,), jnp.float32))
        params["b_hh"].append(scale * jax.random.normal(k[3], (3 * hidden_dim,), jnp.float32))
    return params


def pack_params(params):
    """One-time layout transform: transposes, gate splitting, bias pre-sum, bf16 weights."""
    num_layers = len(params["w_ih"])
    H = params["w_hh"][0].shape[1]
    packed = {
        # Table stays f32 in HBM: only B rows are ever DMA'd, so bf16 buys nothing here.
        "embedding": params["embedding"].astype(jnp.float32),
        "dec_w_t": params["dec_w"].T.astype(jnp.bfloat16),              # (H, V) bf16
        "dec_b": params["dec_b"].reshape(1, -1).astype(jnp.float32),    # (1, V) f32
        "layers": [],
    }
    for l in range(num_layers):
        w_ih, w_hh = params["w_ih"][l], params["w_hh"][l]
        b_ih, b_hh = params["b_ih"][l], params["b_hh"][l]
        w_ih_rz = w_ih[:2 * H].T.astype(jnp.bfloat16)                   # (in, 2H)
        w_hh_rz = w_hh[:2 * H].T.astype(jnp.bfloat16)                   # (H, 2H)
        w_in = w_ih[2 * H:].T.astype(jnp.bfloat16)                      # (in, H)
        w_hn = w_hh[2 * H:].T.astype(jnp.bfloat16)                      # (H, H)
        b_rz = (b_ih[:2 * H] + b_hh[:2 * H]).reshape(1, -1).astype(jnp.float32)
        b_in = b_ih[2 * H:].reshape(1, -1).astype(jnp.float32)
        b_hn = b_hh[2 * H:].reshape(1, -1).astype(jnp.float32)
        packed["layers"].append((w_ih_rz, w_hh_rz, w_in, w_hn, b_rz, b_in, b_hn))
    return packed


# ---------------------------------------------------------------------------
# Forward (mirror of Net.forward): returns (logits (B, V), hidden (L, B, H))
# ---------------------------------------------------------------------------
def net_forward(x_tokens, packed, hidden=None):
    V, E = packed["embedding"].shape
    H = packed["layers"][0][3].shape[0]     # w_hn is (H, H)
    L = len(packed["layers"])
    B = x_tokens.shape[0]

    if hidden is None:
        hidden = jnp.zeros((L, B, H), jnp.float32)

    layer_args = [t for layer in packed["layers"] for t in layer]   # 7 * L tensors
    hidden_idx = 2 + len(layer_args) + 2    # tok, emb, layers..., dec_w_t, dec_b, hidden

    smem = pl.BlockSpec(memory_space=pltpu.MemorySpace.SMEM)
    vmem = pl.BlockSpec(memory_space=pltpu.MemorySpace.VMEM)
    hbm = pl.BlockSpec(memory_space=pl.ANY)

    logits, h_all = pl.pallas_call(
        partial(_fused_kernel, num_layers=L, hidden_dim=H, batch=B),
        out_shape=(jax.ShapeDtypeStruct((B, V), jnp.float32),
                   jax.ShapeDtypeStruct((L, B, H), jnp.float32)),
        in_specs=[smem, hbm] + [vmem] * len(layer_args) + [hbm, vmem, vmem],
        out_specs=(vmem, vmem),
        scratch_shapes=[pltpu.VMEM((B, E), jnp.float32),
                        pltpu.VMEM((H, V), jnp.bfloat16),
                        pltpu.SemaphoreType.DMA((B,)),
                        pltpu.SemaphoreType.DMA((1,))],
        input_output_aliases={hidden_idx: 1},
        compiler_params=pltpu.CompilerParams(vmem_limit_bytes=32 * 1024 * 1024),
    )(x_tokens.astype(jnp.int32), packed["embedding"], *layer_args,
      packed["dec_w_t"], packed["dec_b"], hidden)

    return logits, h_all


# ---------------------------------------------------------------------------
# Pure-JAX reference (same math as torch GRU/Linear, same bf16-at-MXU rounding)
# ---------------------------------------------------------------------------
def _ref_forward(x_tokens, params, hidden):
    def bdot(a, w):  # mimic the kernel: bf16 operands, f32 accumulation
        return jnp.dot(a.astype(jnp.bfloat16), w.astype(jnp.bfloat16).T,
                       preferred_element_type=jnp.float32)

    x = params["embedding"][x_tokens]                      # (B, E)
    h_out = []
    for l in range(len(params["w_ih"])):
        h = hidden[l]
        gi = bdot(x, params["w_ih"][l]) + params["b_ih"][l]
        gh = bdot(h, params["w_hh"][l]) + params["b_hh"][l]
        i_r, i_z, i_n = jnp.split(gi, 3, axis=-1)
        h_r, h_z, h_n = jnp.split(gh, 3, axis=-1)
        r = jax.nn.sigmoid(i_r + h_r)
        z = jax.nn.sigmoid(i_z + h_z)
        n = jnp.tanh(i_n + r * h_n)
        x = (1.0 - z) * n + z * h
        h_out.append(x)
    logits = bdot(x, params["dec_w"]) + params["dec_b"]
    return logits, jnp.stack(h_out, axis=0)


if __name__ == "__main__":
    # Small shapes consistent with the module (seq_len is implicitly 1 in the forward).
    BATCH, VOCAB, EMBED, HIDDEN, LAYERS = 8, 1024, 128, 128, 3

    key = jax.random.PRNGKey(0)
    k_params, k_tokens, k_hidden = jax.random.split(key, 3)

    params = init_params(k_params, VOCAB, EMBED, HIDDEN, LAYERS)
    packed = pack_params(params)              # one-time layout transform (no per-call .T)
    x_tokens = jax.random.randint(k_tokens, (BATCH,), 0, VOCAB, dtype=jnp.int32)
    hidden0 = 0.1 * jax.random.normal(k_hidden, (LAYERS, BATCH, HIDDEN), jnp.float32)

    # Reference computed first (the kernel donates/aliases the hidden-state buffer).
    ref_logits, ref_hidden = _ref_forward(x_tokens, params, hidden0)

    fwd = jax.jit(net_forward)
    logits, hidden_out = fwd(x_tokens, packed, hidden0)
    jax.block_until_ready((logits, hidden_out))

    assert logits.shape == (BATCH, VOCAB)
    assert hidden_out.shape == (LAYERS, BATCH, HIDDEN)
    assert jnp.allclose(logits, ref_logits, atol=5e-3, rtol=5e-3), \
        float(jnp.max(jnp.abs(logits - ref_logits)))
    assert jnp.allclose(hidden_out, ref_hidden, atol=5e-3, rtol=5e-3), \
        float(jnp.max(jnp.abs(hidden_out - ref_hidden)))

    print("KERNEL_OK")
</pallas_src>

<mosaic_0001>
module attributes {stable_mosaic.version = 11 : i64} {
  func.func @_fused_kernel(%arg0: memref<8xi32, #tpu.memory_space<smem>>, %arg1: memref<1024x128xf32, #tpu.memory_space<any>>, %arg2: memref<128x256xbf16, #tpu.memory_space<vmem>>, %arg3: memref<128x256xbf16, #tpu.memory_space<vmem>>, %arg4: memref<128x128xbf16, #tpu.memory_space<vmem>>, %arg5: memref<128x128xbf16, #tpu.memory_space<vmem>>, %arg6: memref<1x256xf32, #tpu.memory_space<vmem>>, %arg7: memref<1x128xf32, #tpu.memory_space<vmem>>, %arg8: memref<1x128xf32, #tpu.memory_space<vmem>>, %arg9: memref<128x256xbf16, #tpu.memory_space<vmem>>, %arg10: memref<128x256xbf16, #tpu.memory_space<vmem>>, %arg11: memref<128x128xbf16, #tpu.memory_space<vmem>>, %arg12: memref<128x128xbf16, #tpu.memory_space<vmem>>, %arg13: memref<1x256xf32, #tpu.memory_space<vmem>>, %arg14: memref<1x128xf32, #tpu.memory_space<vmem>>, %arg15: memref<1x128xf32, #tpu.memory_space<vmem>>, %arg16: memref<128x256xbf16, #tpu.memory_space<vmem>>, %arg17: memref<128x256xbf16, #tpu.memory_space<vmem>>, %arg18: memref<128x128xbf16, #tpu.memory_space<vmem>>, %arg19: memref<128x128xbf16, #tpu.memory_space<vmem>>, %arg20: memref<1x256xf32, #tpu.memory_space<vmem>>, %arg21: memref<1x128xf32, #tpu.memory_space<vmem>>, %arg22: memref<1x128xf32, #tpu.memory_space<vmem>>, %arg23: memref<128x1024xbf16, #tpu.memory_space<any>>, %arg24: memref<1x1024xf32, #tpu.memory_space<vmem>>, %arg25: memref<3x8x128xf32, #tpu.memory_space<vmem>>, %arg26: memref<8x1024xf32, #tpu.memory_space<vmem>>, %arg27: memref<3x8x128xf32, #tpu.memory_space<vmem>>, %arg28: memref<8x128xf32, #tpu.memory_space<vmem>>, %arg29: memref<128x1024xbf16, #tpu.memory_space<vmem>>, %arg30: memref<8x!tpu.dma_semaphore, #tpu.memory_space<semaphore_mem>>, %arg31: memref<1x!tpu.dma_semaphore, #tpu.memory_space<semaphore_mem>>) attributes {dimension_semantics = [], scalar_prefetch = 0 : i64, scratch_operands = 4 : i64, tpu.core_type = #tpu.core_type<tc>} {
    %c0 = arith.constant 0 : index
    %0 = memref.load %arg0[%c0] : memref<8xi32, #tpu.memory_space<smem>>
    %c1 = arith.constant 1 : index
    %1 = memref.load %arg0[%c1] : memref<8xi32, #tpu.memory_space<smem>>
    %c2 = arith.constant 2 : index
    %2 = memref.load %arg0[%c2] : memref<8xi32, #tpu.memory_space<smem>>
    %c3 = arith.constant 3 : index
    %3 = memref.load %arg0[%c3] : memref<8xi32, #tpu.memory_space<smem>>
    %c4 = arith.constant 4 : index
    %4 = memref.load %arg0[%c4] : memref<8xi32, #tpu.memory_space<smem>>
    %c5 = arith.constant 5 : index
    %5 = memref.load %arg0[%c5] : memref<8xi32, #tpu.memory_space<smem>>
    %c6 = arith.constant 6 : index
    %6 = memref.load %arg0[%c6] : memref<8xi32, #tpu.memory_space<smem>>
    %c7 = arith.constant 7 : index
    %7 = memref.load %arg0[%c7] : memref<8xi32, #tpu.memory_space<smem>>
    %c0_i32 = arith.constant 0 : i32
    %c0_i32_0 = arith.constant 0 : i32
    %c0_i32_1 = arith.constant 0 : i32
    %8 = tpu.memref_slice %arg1[%0, %c0_i32_1] : memref<1024x128xf32, #tpu.memory_space<any>> -> memref<1x128xf32, #tpu.memory_space<any>>
    %9 = tpu.memref_squeeze %8 : memref<1x128xf32, #tpu.memory_space<any>> -> memref<128xf32, #tpu.memory_space<any>>
    %c0_i32_2 = arith.constant 0 : i32
    %10 = tpu.memref_slice %arg28[%c0_i32, %c0_i32_2] : memref<8x128xf32, #tpu.memory_space<vmem>> -> memref<1x128xf32, #tpu.memory_space<vmem>>
    %11 = tpu.memref_squeeze %10 : memref<1x128xf32, #tpu.memory_space<vmem>> -> memref<128xf32, #tpu.memory_space<vmem>>
    %12 = tpu.memref_slice %arg30[%c0_i32_0] : memref<8x!tpu.dma_semaphore, #tpu.memory_space<semaphore_mem>> -> memref<1x!tpu.dma_semaphore, #tpu.memory_space<semaphore_mem>>
    %13 = tpu.memref_squeeze %12 : memref<1x!tpu.dma_semaphore, #tpu.memory_space<semaphore_mem>> -> memref<!tpu.dma_semaphore, #tpu.memory_space<semaphore_mem>>
    tpu.enqueue_dma source(%9 : memref<128xf32, #tpu.memory_space<any>>) target(%11 : memref<128xf32, #tpu.memory_space<vmem>>) target_semaphore(%13 : memref<!tpu.dma_semaphore, #tpu.memory_space<semaphore_mem>>)
    %c1_i32 = arith.constant 1 : i32
    %c1_i32_3 = arith.constant 1 : i32
    %c0_i32_4 = arith.constant 0 : i32
    %14 = tpu.memref_slice %arg1[%1, %c0_i32_4] : memref<1024x128xf32, #tpu.memory_space<any>> -> memref<1x128xf32, #tpu.memory_space<any>>
    %15 = tpu.memref_squeeze %14 : memref<1x128xf32, #tpu.memory_space<any>> -> memref<128xf32, #tpu.memory_space<any>>
    %c0_i32_5 = arith.constant 0 : i32
    %16 = tpu.memref_slice %arg28[%c1_i32, %c0_i32_5] : memref<8x128xf32, #tpu.memory_space<vmem>> -> memref<1x128xf32, #tpu.memory_space<vmem>>
    %17 = tpu.memref_squeeze %16 : memref<1x128xf32, #tpu.memory_space<vmem>> -> memref<128xf32, #tpu.memory_space<vmem>>
    %18 = tpu.memref_slice %arg30[%c1_i32_3] : memref<8x!tpu.dma_semaphore, #tpu.memory_space<semaphore_mem>> -> memref<1x!tpu.dma_semaphore, #tpu.memory_space<semaphore_mem>>
    %19 = tpu.memref_squeeze %18 : memref<1x!tpu.dma_semaphore, #tpu.memory_space<semaphore_mem>> -> memref<!tpu.dma_semaphore, #tpu.memory_space<semaphore_mem>>
    tpu.enqueue_dma source(%15 : memref<128xf32, #tpu.memory_space<any>>) target(%17 : memref<128xf32, #tpu.memory_space<vmem>>) target_semaphore(%19 : memref<!tpu.dma_semaphore, #tpu.memory_space<semaphore_mem>>)
    %c2_i32 = arith.constant 2 : i32
    %c2_i32_6 = arith.constant 2 : i32
    %c0_i32_7 = arith.constant 0 : i32
    %20 = tpu.memref_slice %arg1[%2, %c0_i32_7] : memref<1024x128xf32, #tpu.memory_space<any>> -> memref<1x128xf32, #tpu.memory_space<any>>
    %21 = tpu.memref_squeeze %20 : memref<1x128xf32, #tpu.memory_space<any>> -> memref<128xf32, #tpu.memory_space<any>>
    %c0_i32_8 = arith.constant 0 : i32
    %22 = tpu.memref_slice %arg28[%c2_i32, %c0_i32_8] : memref<8x128xf32, #tpu.memory_space<vmem>> -> memref<1x128xf32, #tpu.memory_space<vmem>>
    %23 = tpu.memref_squeeze %22 : memref<1x128xf32, #tpu.memory_space<vmem>> -> memref<128xf32, #tpu.memory_space<vmem>>
    %24 = tpu.memref_slice %arg30[%c2_i32_6] : memref<8x!tpu.dma_semaphore, #tpu.memory_space<semaphore_mem>> -> memref<1x!tpu.dma_semaphore, #tpu.memory_space<semaphore_mem>>
    %25 = tpu.memref_squeeze %24 : memref<1x!tpu.dma_semaphore, #tpu.memory_space<semaphore_mem>> -> memref<!tpu.dma_semaphore, #tpu.memory_space<semaphore_mem>>
    tpu.enqueue_dma source(%21 : memref<128xf32, #tpu.memory_space<any>>) target(%23 : memref<128xf32, #tpu.memory_space<vmem>>) target_semaphore(%25 : memref<!tpu.dma_semaphore, #tpu.memory_space<semaphore_mem>>)
    %c3_i32 = arith.constant 3 : i32
    %c3_i32_9 = arith.constant 3 : i32
    %c0_i32_10 = arith.constant 0 : i32
    %26 = tpu.memref_slice %arg1[%3, %c0_i32_10] : memref<1024x128xf32, #tpu.memory_space<any>> -> memref<1x128xf32, #tpu.memory_space<any>>
    %27 = tpu.memref_squeeze %26 : memref<1x128xf32, #tpu.memory_space<any>> -> memref<128xf32, #tpu.memory_space<any>>
    %c0_i32_11 = arith.constant 0 : i32
    %28 = tpu.memref_slice %arg28[%c3_i32, %c0_i32_11] : memref<8x128xf32, #tpu.memory_space<vmem>> -> memref<1x128xf32, #tpu.memory_space<vmem>>
    %29 = tpu.memref_squeeze %28 : memref<1x128xf32, #tpu.memory_space<vmem>> -> memref<128xf32, #tpu.memory_space<vmem>>
    %30 = tpu.memref_slice %arg30[%c3_i32_9] : memref<8x!tpu.dma_semaphore, #tpu.memory_space<semaphore_mem>> -> memref<1x!tpu.dma_semaphore, #tpu.memory_space<semaphore_mem>>
    %31 = tpu.memref_squeeze %30 : memref<1x!tpu.dma_semaphore, #tpu.memory_space<semaphore_mem>> -> memref<!tpu.dma_semaphore, #tpu.memory_space<semaphore_mem>>
    tpu.enqueue_dma source(%27 : memref<128xf32, #tpu.memory_space<any>>) target(%29 : memref<128xf32, #tpu.memory_space<vmem>>) target_semaphore(%31 : memref<!tpu.dma_semaphore, #tpu.memory_space<semaphore_mem>>)
    %c4_i32 = arith.constant 4 : i32
    %c4_i32_12 = arith.constant 4 : i32
    %c0_i32_13 = arith.constant 0 : i32
    %32 = tpu.memref_slice %arg1[%4, %c0_i32_13] : memref<1024x128xf32, #tpu.memory_space<any>> -> memref<1x128xf32, #tpu.memory_space<any>>
    %33 = tpu.memref_squeeze %32 : memref<1x128xf32, #tpu.memory_space<any>> -> memref<128xf32, #tpu.memory_space<any>>
    %c0_i32_14 = arith.constant 0 : i32
    %34 = tpu.memref_slice %arg28[%c4_i32, %c0_i32_14] : memref<8x128xf32, #tpu.memory_space<vmem>> -> memref<1x128xf32, #tpu.memory_space<vmem>>
    %35 = tpu.memref_squeeze %34 : memref<1x128xf32, #tpu.memory_space<vmem>> -> memref<128xf32, #tpu.memory_space<vmem>>
    %36 = tpu.memref_slice %arg30[%c4_i32_12] : memref<8x!tpu.dma_semaphore, #tpu.memory_space<semaphore_mem>> -> memref<1x!tpu.dma_semaphore, #tpu.memory_space<semaphore_mem>>
    %37 = tpu.memref_squeeze %36 : memref<1x!tpu.dma_semaphore, #tpu.memory_space<semaphore_mem>> -> memref<!tpu.dma_semaphore, #tpu.memory_space<semaphore_mem>>
    tpu.enqueue_dma source(%33 : memref<128xf32, #tpu.memory_space<any>>) target(%35 : memref<128xf32, #tpu.memory_space<vmem>>) target_semaphore(%37 : memref<!tpu.dma_semaphore, #tpu.memory_space<semaphore_mem>>)
    %c5_i32 = arith.constant 5 : i32
    %c5_i32_15 = arith.constant 5 : i32
    %c0_i32_16 = arith.constant 0 : i32
    %38 = tpu.memref_slice %arg1[%5, %c0_i32_16] : memref<1024x128xf32, #tpu.memory_space<any>> -> memref<1x128xf32, #tpu.memory_space<any>>
    %39 = tpu.memref_squeeze %38 : memref<1x128xf32, #tpu.memory_space<any>> -> memref<128xf32, #tpu.memory_space<any>>
    %c0_i32_17 = arith.constant 0 : i32
    %40 = tpu.memref_slice %arg28[%c5_i32, %c0_i32_17] : memref<8x128xf32, #tpu.memory_space<vmem>> -> memref<1x128xf32, #tpu.memory_space<vmem>>
    %41 = tpu.memref_squeeze %40 : memref<1x128xf32, #tpu.memory_space<vmem>> -> memref<128xf32, #tpu.memory_space<vmem>>
    %42 = tpu.memref_slice %arg30[%c5_i32_15] : memref<8x!tpu.dma_semaphore, #tpu.memory_space<semaphore_mem>> -> memref<1x!tpu.dma_semaphore, #tpu.memory_space<semaphore_mem>>
    %43 = tpu.memref_squeeze %42 : memref<1x!tpu.dma_semaphore, #tpu.memory_space<semaphore_mem>> -> memref<!tpu.dma_semaphore, #tpu.memory_space<semaphore_mem>>
    tpu.enqueue_dma source(%39 : memref<128xf32, #tpu.memory_space<any>>) target(%41 : memref<128xf32, #tpu.memory_space<vmem>>) target_semaphore(%43 : memref<!tpu.dma_semaphore, #tpu.memory_space<semaphore_mem>>)
    %c6_i32 = arith.constant 6 : i32
    %c6_i32_18 = arith.constant 6 : i32
    %c0_i32_19 = arith.constant 0 : i32
    %44 = tpu.memref_slice %arg1[%6, %c0_i32_19] : memref<1024x128xf32, #tpu.memory_space<any>> -> memref<1x128xf32, #tpu.memory_space<any>>
    %45 = tpu.memref_squeeze %44 : memref<1x128xf32, #tpu.memory_space<any>> -> memref<128xf32, #tpu.memory_space<any>>
    %c0_i32_20 = arith.constant 0 : i32
    %46 = tpu.memref_slice %arg28[%c6_i32, %c0_i32_20] : memref<8x128xf32, #tpu.memory_space<vmem>> -> memref<1x128xf32, #tpu.memory_space<vmem>>
    %47 = tpu.memref_squeeze %46 : memref<1x128xf32, #tpu.memory_space<vmem>> -> memref<128xf32, #tpu.memory_space<vmem>>
    %48 = tpu.memref_slice %arg30[%c6_i32_18] : memref<8x!tpu.dma_semaphore, #tpu.memory_space<semaphore_mem>> -> memref<1x!tpu.dma_semaphore, #tpu.memory_space<semaphore_mem>>
    %49 = tpu.memref_squeeze %48 : memref<1x!tpu.dma_semaphore, #tpu.memory_space<semaphore_mem>> -> memref<!tpu.dma_semaphore, #tpu.memory_space<semaphore_mem>>
    tpu.enqueue_dma source(%45 : memref<128xf32, #tpu.memory_space<any>>) target(%47 : memref<128xf32, #tpu.memory_space<vmem>>) target_semaphore(%49 : memref<!tpu.dma_semaphore, #tpu.memory_space<semaphore_mem>>)
    %c7_i32 = arith.constant 7 : i32
    %c7_i32_21 = arith.constant 7 : i32
    %c0_i32_22 = arith.constant 0 : i32
    %50 = tpu.memref_slice %arg1[%7, %c0_i32_22] : memref<1024x128xf32, #tpu.memory_space<any>> -> memref<1x128xf32, #tpu.memory_space<any>>
    %51 = tpu.memref_squeeze %50 : memref<1x128xf32, #tpu.memory_space<any>> -> memref<128xf32, #tpu.memory_space<any>>
    %c0_i32_23 = arith.constant 0 : i32
    %52 = tpu.memref_slice %arg28[%c7_i32, %c0_i32_23] : memref<8x128xf32, #tpu.memory_space<vmem>> -> memref<1x128xf32, #tpu.memory_space<vmem>>
    %53 = tpu.memref_squeeze %52 : memref<1x128xf32, #tpu.memory_space<vmem>> -> memref<128xf32, #tpu.memory_space<vmem>>
    %54 = tpu.memref_slice %arg30[%c7_i32_21] : memref<8x!tpu.dma_semaphore, #tpu.memory_space<semaphore_mem>> -> memref<1x!tpu.dma_semaphore, #tpu.memory_space<semaphore_mem>>
    %55 = tpu.memref_squeeze %54 : memref<1x!tpu.dma_semaphore, #tpu.memory_space<semaphore_mem>> -> memref<!tpu.dma_semaphore, #tpu.memory_space<semaphore_mem>>
    tpu.enqueue_dma source(%51 : memref<128xf32, #tpu.memory_space<any>>) target(%53 : memref<128xf32, #tpu.memory_space<vmem>>) target_semaphore(%55 : memref<!tpu.dma_semaphore, #tpu.memory_space<semaphore_mem>>)
    %c0_i32_24 = arith.constant 0 : i32
    %56 = tpu.memref_slice %arg31[%c0_i32_24] : memref<1x!tpu.dma_semaphore, #tpu.memory_space<semaphore_mem>> -> memref<1x!tpu.dma_semaphore, #tpu.memory_space<semaphore_mem>>
    %57 = tpu.memref_squeeze %56 : memref<1x!tpu.dma_semaphore, #tpu.memory_space<semaphore_mem>> -> memref<!tpu.dma_semaphore, #tpu.memory_space<semaphore_mem>>
    tpu.enqueue_dma source(%arg23 : memref<128x1024xbf16, #tpu.memory_space<any>>) target(%arg29 : memref<128x1024xbf16, #tpu.memory_space<vmem>>) target_semaphore(%57 : memref<!tpu.dma_semaphore, #tpu.memory_space<semaphore_mem>>)
    %c0_25 = arith.constant 0 : index
    %c0_26 = arith.constant 0 : index
    %c0_27 = arith.constant 0 : index
    %58 = vector.load %arg25[%c0_25, %c0_26, %c0_27] : memref<3x8x128xf32, #tpu.memory_space<vmem>>, vector<1x8x128xf32>
    %59 = vector.shape_cast %58 : vector<1x8x128xf32> to vector<8x128xf32>
    %60 = arith.truncf %59 : vector<8x128xf32> to vector<8x128xbf16>
    %c0_28 = arith.constant 0 : index
    %c0_29 = arith.constant 0 : index
    %61 = vector.load %arg3[%c0_28, %c0_29] : memref<128x256xbf16, #tpu.memory_space<vmem>>, vector<128x256xbf16>
    %cst = arith.constant dense<0.000000e+00> : vector<8x256xf32>
    %62 = tpu.matmul %60, %61, %cst {dimension_numbers = #tpu.dot_dimension_numbers<[1], [0], [0], [1], [0, 0, 1, 1], [], []>} : vector<8x128xbf16>, vector<128x256xbf16>, vector<8x256xf32> -> vector<8x256xf32>
    %c0_30 = arith.constant 0 : index
    %c0_31 = arith.constant 0 : index
    %63 = vector.load %arg5[%c0_30, %c0_31] : memref<128x128xbf16, #tpu.memory_space<vmem>>, vector<128x128xbf16>
    %cst_32 = arith.constant dense<0.000000e+00> : vector<8x128xf32>
    %64 = tpu.matmul %60, %63, %cst_32 {dimension_numbers = #tpu.dot_dimension_numbers<[1], [0], [0], [1], [0, 0, 1, 1], [], []>} : vector<8x128xbf16>, vector<128x128xbf16>, vector<8x128xf32> -> vector<8x128xf32>
    %c0_i32_33 = arith.constant 0 : i32
    %c0_i32_34 = arith.constant 0 : i32
    %c0_i32_35 = arith.constant 0 : i32
    %65 = tpu.memref_slice %arg1[%0, %c0_i32_35] : memref<1024x128xf32, #tpu.memory_space<any>> -> memref<1x128xf32, #tpu.memory_space<any>>
    %66 = tpu.memref_squeeze %65 : memref<1x128xf32, #tpu.memory_space<any>> -> memref<128xf32, #tpu.memory_space<any>>
    %c0_i32_36 = arith.constant 0 : i32
    %67 = tpu.memref_slice %arg28[%c0_i32_33, %c0_i32_36] : memref<8x128xf32, #tpu.memory_space<vmem>> -> memref<1x128xf32, #tpu.memory_space<vmem>>
    %68 = tpu.memref_squeeze %67 : memref<1x128xf32, #tpu.memory_space<vmem>> -> memref<128xf32, #tpu.memory_space<vmem>>
    %69 = tpu.memref_slice %arg30[%c0_i32_34] : memref<8x!tpu.dma_semaphore, #tpu.memory_space<semaphore_mem>> -> memref<1x!tpu.dma_semaphore, #tpu.memory_space<semaphore_mem>>
    %70 = tpu.memref_squeeze %69 : memref<1x!tpu.dma_semaphore, #tpu.memory_space<semaphore_mem>> -> memref<!tpu.dma_semaphore, #tpu.memory_space<semaphore_mem>>
    tpu.wait_dma2 semaphore(%70 : memref<!tpu.dma_semaphore, #tpu.memory_space<semaphore_mem>>) src(%66 : memref<128xf32, #tpu.memory_space<any>>) dst(%68 : memref<128xf32, #tpu.memory_space<vmem>>)
    %c1_i32_37 = arith.constant 1 : i32
    %c1_i32_38 = arith.constant 1 : i32
    %c0_i32_39 = arith.constant 0 : i32
    %71 = tpu.memref_slice %arg1[%1, %c0_i32_39] : memref<1024x128xf32, #tpu.memory_space<any>> -> memref<1x128xf32, #tpu.memory_space<any>>
    %72 = tpu.memref_squeeze %71 : memref<1x128xf32, #tpu.memory_space<any>> -> memref<128xf32, #tpu.memory_space<any>>
    %c0_i32_40 = arith.constant 0 : i32
    %73 = tpu.memref_slice %arg28[%c1_i32_37, %c0_i32_40] : memref<8x128xf32, #tpu.memory_space<vmem>> -> memref<1x128xf32, #tpu.memory_space<vmem>>
    %74 = tpu.memref_squeeze %73 : memref<1x128xf32, #tpu.memory_space<vmem>> -> memref<128xf32, #tpu.memory_space<vmem>>
    %75 = tpu.memref_slice %arg30[%c1_i32_38] : memref<8x!tpu.dma_semaphore, #tpu.memory_space<semaphore_mem>> -> memref<1x!tpu.dma_semaphore, #tpu.memory_space<semaphore_mem>>
    %76 = tpu.memref_squeeze %75 : memref<1x!tpu.dma_semaphore, #tpu.memory_space<semaphore_mem>> -> memref<!tpu.dma_semaphore, #tpu.memory_space<semaphore_mem>>
    tpu.wait_dma2 semaphore(%76 : memref<!tpu.dma_semaphore, #tpu.memory_space<semaphore_mem>>) src(%72 : memref<128xf32, #tpu.memory_space<any>>) dst(%74 : memref<128xf32, #tpu.memory_space<vmem>>)
    %c2_i32_41 = arith.constant 2 : i32
    %c2_i32_42 = arith.constant 2 : i32
    %c0_i32_43 = arith.constant 0 : i32
    %77 = tpu.memref_slice %arg1[%2, %c0_i32_43] : memref<1024x128xf32, #tpu.memory_space<any>> -> memref<1x128xf32, #tpu.memory_space<any>>
    %78 = tpu.memref_squeeze %77 : memref<1x128xf32, #tpu.memory_space<any>> -> memref<128xf32, #tpu.memory_space<any>>
    %c0_i32_44 = arith.constant 0 : i32
    %79 = tpu.memref_slice %arg28[%c2_i32_41, %c0_i32_44] : memref<8x128xf32, #tpu.memory_space<vmem>> -> memref<1x128xf32, #tpu.memory_space<vmem>>
    %80 = tpu.memref_squeeze %79 : memref<1x128xf32, #tpu.memory_space<vmem>> -> memref<128xf32, #tpu.memory_space<vmem>>
    %81 = tpu.memref_slice %arg30[%c2_i32_42] : memref<8x!tpu.dma_semaphore, #tpu.memory_space<semaphore_mem>> -> memref<1x!tpu.dma_semaphore, #tpu.memory_space<semaphore_mem>>
    %82 = tpu.memref_squeeze %81 : memref<1x!tpu.dma_semaphore, #tpu.memory_space<semaphore_mem>> -> memref<!tpu.dma_semaphore, #tpu.memory_space<semaphore_mem>>
    tpu.wait_dma2 semaphore(%82 : memref<!tpu.dma_semaphore, #tpu.memory_space<semaphore_mem>>) src(%78 : memref<128xf32, #tpu.memory_space<any>>) dst(%80 : memref<128xf32, #tpu.memory_space<vmem>>)
    %c3_i32_45 = arith.constant 3 : i32
    %c3_i32_46 = arith.constant 3 : i32
    %c0_i32_47 = arith.constant 0 : i32
    %83 = tpu.memref_slice %arg1[%3, %c0_i32_47] : memref<1024x128xf32, #tpu.memory_space<any>> -> memref<1x128xf32, #tpu.memory_space<any>>
    %84 = tpu.memref_squeeze %83 : memref<1x128xf32, #tpu.memory_space<any>> -> memref<128xf32, #tpu.memory_space<any>>
    %c0_i32_48 = arith.constant 0 : i32
    %85 = tpu.memref_slice %arg28[%c3_i32_45, %c0_i32_48] : memref<8x128xf32, #tpu.memory_space<vmem>> -> memref<1x128xf32, #tpu.memory_space<vmem>>
    %86 = tpu.memref_squeeze %85 : memref<1x128xf32, #tpu.memory_space<vmem>> -> memref<128xf32, #tpu.memory_space<vmem>>
    %87 = tpu.memref_slice %arg30[%c3_i32_46] : memref<8x!tpu.dma_semaphore, #tpu.memory_space<semaphore_mem>> -> memref<1x!tpu.dma_semaphore, #tpu.memory_space<semaphore_mem>>
    %88 = tpu.memref_squeeze %87 : memref<1x!tpu.dma_semaphore, #tpu.memory_space<semaphore_mem>> -> memref<!tpu.dma_semaphore, #tpu.memory_space<semaphore_mem>>
    tpu.wait_dma2 semaphore(%88 : memref<!tpu.dma_semaphore, #tpu.memory_space<semaphore_mem>>) src(%84 : memref<128xf32, #tpu.memory_space<any>>) dst(%86 : memref<128xf32, #tpu.memory_space<vmem>>)
    %c4_i32_49 = arith.constant 4 : i32
    %c4_i32_50 = arith.constant 4 : i32
    %c0_i32_51 = arith.constant 0 : i32
    %89 = tpu.memref_slice %arg1[%4, %c0_i32_51] : memref<1024x128xf32, #tpu.memory_space<any>> -> memref<1x128xf32, #tpu.memory_space<any>>
    %90 = tpu.memref_squeeze %89 : memref<1x128xf32, #tpu.memory_space<any>> -> memref<128xf32, #tpu.memory_space<any>>
    %c0_i32_52 = arith.constant 0 : i32
    %91 = tpu.memref_slice %arg28[%c4_i32_49, %c0_i32_52] : memref<8x128xf32, #tpu.memory_space<vmem>> -> memref<1x128xf32, #tpu.memory_space<vmem>>
    %92 = tpu.memref_squeeze %91 : memref<1x128xf32, #tpu.memory_space<vmem>> -> memref<128xf32, #tpu.memory_space<vmem>>
    %93 = tpu.memref_slice %arg30[%c4_i32_50] : memref<8x!tpu.dma_semaphore, #tpu.memory_space<semaphore_mem>> -> memref<1x!tpu.dma_semaphore, #tpu.memory_space<semaphore_mem>>
    %94 = tpu.memref_squeeze %93 : memref<1x!tpu.dma_semaphore, #tpu.memory_space<semaphore_mem>> -> memref<!tpu.dma_semaphore, #tpu.memory_space<semaphore_mem>>
    tpu.wait_dma2 semaphore(%94 : memref<!tpu.dma_semaphore, #tpu.memory_space<semaphore_mem>>) src(%90 : memref<128xf32, #tpu.memory_space<any>>) dst(%92 : memref<128xf32, #tpu.memory_space<vmem>>)
    %c5_i32_53 = arith.constant 5 : i32
    %c5_i32_54 = arith.constant 5 : i32
    %c0_i32_55 = arith.constant 0 : i32
    %95 = tpu.memref_slice %arg1[%5, %c0_i32_55] : memref<1024x128xf32, #tpu.memory_space<any>> -> memref<1x128xf32, #tpu.memory_space<any>>
    %96 = tpu.memref_squeeze %95 : memref<1x128xf32, #tpu.memory_space<any>> -> memref<128xf32, #tpu.memory_space<any>>
    %c0_i32_56 = arith.constant 0 : i32
    %97 = tpu.memref_slice %arg28[%c5_i32_53, %c0_i32_56] : memref<8x128xf32, #tpu.memory_space<vmem>> -> memref<1x128xf32, #tpu.memory_space<vmem>>
    %98 = tpu.memref_squeeze %97 : memref<1x128xf32, #tpu.memory_space<vmem>> -> memref<128xf32, #tpu.memory_space<vmem>>
    %99 = tpu.memref_slice %arg30[%c5_i32_54] : memref<8x!tpu.dma_semaphore, #tpu.memory_space<semaphore_mem>> -> memref<1x!tpu.dma_semaphore, #tpu.memory_space<semaphore_mem>>
    %100 = tpu.memref_squeeze %99 : memref<1x!tpu.dma_semaphore, #tpu.memory_space<semaphore_mem>> -> memref<!tpu.dma_semaphore, #tpu.memory_space<semaphore_mem>>
    tpu.wait_dma2 semaphore(%100 : memref<!tpu.dma_semaphore, #tpu.memory_space<semaphore_mem>>) src(%96 : memref<128xf32, #tpu.memory_space<any>>) dst(%98 : memref<128xf32, #tpu.memory_space<vmem>>)
    %c6_i32_57 = arith.constant 6 : i32
    %c6_i32_58 = arith.constant 6 : i32
    %c0_i32_59 = arith.constant 0 : i32
    %101 = tpu.memref_slice %arg1[%6, %c0_i32_59] : memref<1024x128xf32, #tpu.memory_space<any>> -> memref<1x128xf32, #tpu.memory_space<any>>
    %102 = tpu.memref_squeeze %101 : memref<1x128xf32, #tpu.memory_space<any>> -> memref<128xf32, #tpu.memory_space<any>>
    %c0_i32_60 = arith.constant 0 : i32
    %103 = tpu.memref_slice %arg28[%c6_i32_57, %c0_i32_60] : memref<8x128xf32, #tpu.memory_space<vmem>> -> memref<1x128xf32, #tpu.memory_space<vmem>>
    %104 = tpu.memref_squeeze %103 : memref<1x128xf32, #tpu.memory_space<vmem>> -> memref<128xf32, #tpu.memory_space<vmem>>
    %105 = tpu.memref_slice %arg30[%c6_i32_58] : memref<8x!tpu.dma_semaphore, #tpu.memory_space<semaphore_mem>> -> memref<1x!tpu.dma_semaphore, #tpu.memory_space<semaphore_mem>>
    %106 = tpu.memref_squeeze %105 : memref<1x!tpu.dma_semaphore, #tpu.memory_space<semaphore_mem>> -> memref<!tpu.dma_semaphore, #tpu.memory_space<semaphore_mem>>
    tpu.wait_dma2 semaphore(%106 : memref<!tpu.dma_semaphore, #tpu.memory_space<semaphore_mem>>) src(%102 : memref<128xf32, #tpu.memory_space<any>>) dst(%104 : memref<128xf32, #tpu.memory_space<vmem>>)
    %c7_i32_61 = arith.constant 7 : i32
    %c7_i32_62 = arith.constant 7 : i32
    %c0_i32_63 = arith.constant 0 : i32
    %107 = tpu.memref_slice %arg1[%7, %c0_i32_63] : memref<1024x128xf32, #tpu.memory_space<any>> -> memref<1x128xf32, #tpu.memory_space<any>>
    %108 = tpu.memref_squeeze %107 : memref<1x128xf32, #tpu.memory_space<any>> -> memref<128xf32, #tpu.memory_space<any>>
    %c0_i32_64 = arith.constant 0 : i32
    %109 = tpu.memref_slice %arg28[%c7_i32_61, %c0_i32_64] : memref<8x128xf32, #tpu.memory_space<vmem>> -> memref<1x128xf32, #tpu.memory_space<vmem>>
    %110 = tpu.memref_squeeze %109 : memref<1x128xf32, #tpu.memory_space<vmem>> -> memref<128xf32, #tpu.memory_space<vmem>>
    %111 = tpu.memref_slice %arg30[%c7_i32_62] : memref<8x!tpu.dma_semaphore, #tpu.memory_space<semaphore_mem>> -> memref<1x!tpu.dma_semaphore, #tpu.memory_space<semaphore_mem>>
    %112 = tpu.memref_squeeze %111 : memref<1x!tpu.dma_semaphore, #tpu.memory_space<semaphore_mem>> -> memref<!tpu.dma_semaphore, #tpu.memory_space<semaphore_mem>>
    tpu.wait_dma2 semaphore(%112 : memref<!tpu.dma_semaphore, #tpu.memory_space<semaphore_mem>>) src(%108 : memref<128xf32, #tpu.memory_space<any>>) dst(%110 : memref<128xf32, #tpu.memory_space<vmem>>)
    %c0_65 = arith.constant 0 : index
    %c0_66 = arith.constant 0 : index
    %113 = vector.load %arg28[%c0_65, %c0_66] : memref<8x128xf32, #tpu.memory_space<vmem>>, vector<8x128xf32>
    %114 = arith.truncf %113 : vector<8x128xf32> to vector<8x128xbf16>
    %c0_67 = arith.constant 0 : index
    %c0_68 = arith.constant 0 : index
    %115 = vector.load %arg2[%c0_67, %c0_68] : memref<128x256xbf16, #tpu.memory_space<vmem>>, vector<128x256xbf16>
    %cst_69 = arith.constant dense<0.000000e+00> : vector<8x256xf32>
    %116 = tpu.matmul %114, %115, %cst_69 {dimension_numbers = #tpu.dot_dimension_numbers<[1], [0], [0], [1], [0, 0, 1, 1], [], []>} : vector<8x128xbf16>, vector<128x256xbf16>, vector<8x256xf32> -> vector<8x256xf32>
    %117 = arith.addf %116, %62 : vector<8x256xf32>
    %c0_70 = arith.constant 0 : index
    %c0_71 = arith.constant 0 : index
    %118 = vector.load %arg6[%c0_70, %c0_71] : memref<1x256xf32, #tpu.memory_space<vmem>>, vector<1x256xf32>
    %119 = vector.broadcast %118 : vector<1x256xf32> to vector<8x256xf32>
    %120 = arith.addf %117, %119 : vector<8x256xf32>
    %121 = arith.negf %120 : vector<8x256xf32>
    %122 = math.exp %121 : vector<8x256xf32>
    %cst_72 = arith.constant 1.000000e+00 : f32
    %123 = vector.broadcast %cst_72 : f32 to vector<8x256xf32>
    %124 = arith.addf %123, %122 : vector<8x256xf32>
    %125 = arith.divf %123, %124 : vector<8x256xf32>
    %126 = vector.extract_strided_slice %125 {offsets = [0, 0], sizes = [8, 128], strides = [1, 1]} : vector<8x256xf32> to vector<8x128xf32>
    %127 = vector.extract_strided_slice %125 {offsets = [0, 128], sizes = [8, 128], strides = [1, 1]} : vector<8x256xf32> to vector<8x128xf32>
    %c0_73 = arith.constant 0 : index
    %c0_74 = arith.constant 0 : index
    %128 = vector.load %arg4[%c0_73, %c0_74] : memref<128x128xbf16, #tpu.memory_space<vmem>>, vector<128x128xbf16>
    %cst_75 = arith.constant dense<0.000000e+00> : vector<8x128xf32>
    %129 = tpu.matmul %114, %128, %cst_75 {dimension_numbers = #tpu.dot_dimension_numbers<[1], [0], [0], [1], [0, 0, 1, 1], [], []>} : vector<8x128xbf16>, vector<128x128xbf16>, vector<8x128xf32> -> vector<8x128xf32>
    %c0_76 = arith.constant 0 : index
    %c0_77 = arith.constant 0 : index
    %130 = vector.load %arg7[%c0_76, %c0_77] : memref<1x128xf32, #tpu.memory_space<vmem>>, vector<1x128xf32>
    %131 = vector.broadcast %130 : vector<1x128xf32> to vector<8x128xf32>
    %132 = arith.addf %129, %131 : vector<8x128xf32>
    %c0_78 = arith.constant 0 : index
    %c0_79 = arith.constant 0 : index
    %133 = vector.load %arg8[%c0_78, %c0_79] : memref<1x128xf32, #tpu.memory_space<vmem>>, vector<1x128xf32>
    %134 = vector.broadcast %133 : vector<1x128xf32> to vector<8x128xf32>
    %135 = arith.addf %64, %134 : vector<8x128xf32>
    %136 = arith.mulf %126, %135 : vector<8x128xf32>
    %137 = arith.addf %132, %136 : vector<8x128xf32>
    %138 = math.tanh %137 : vector<8x128xf32>
    %cst_80 = arith.constant 1.000000e+00 : f32
    %139 = vector.broadcast %cst_80 : f32 to vector<8x128xf32>
    %140 = arith.subf %139, %127 : vector<8x128xf32>
    %141 = arith.mulf %140, %138 : vector<8x128xf32>
    %142 = arith.mulf %127, %59 : vector<8x128xf32>
    %143 = arith.addf %141, %142 : vector<8x128xf32>
    %c0_81 = arith.constant 0 : index
    %c0_82 = arith.constant 0 : index
    %c0_83 = arith.constant 0 : index
    %144 = vector.load %arg27[%c0_81, %c0_82, %c0_83] : memref<3x8x128xf32, #tpu.memory_space<vmem>>, vector<1x8x128xf32>
    %145 = vector.shape_cast %144 : vector<1x8x128xf32> to vector<8x128xf32>
    %146 = vector.shape_cast %143 : vector<8x128xf32> to vector<1x8x128xf32>
    tpu.vector_store %arg27[%c0_81, %c0_82, %c0_83], %146 {strides = array<i32>} : memref<3x8x128xf32, #tpu.memory_space<vmem>>, vector<1x8x128xf32>,
    %147 = arith.truncf %143 : vector<8x128xf32> to vector<8x128xbf16>
    %c1_84 = arith.constant 1 : index
    %c0_85 = arith.constant 0 : index
    %c0_86 = arith.constant 0 : index
    %148 = vector.load %arg25[%c1_84, %c0_85, %c0_86] : memref<3x8x128xf32, #tpu.memory_space<vmem>>, vector<1x8x128xf32>
    %149 = vector.shape_cast %148 : vector<1x8x128xf32> to vector<8x128xf32>
    %150 = arith.truncf %149 : vector<8x128xf32> to vector<8x128xbf16>
    %c0_87 = arith.constant 0 : index
    %c0_88 = arith.constant 0 : index
    %151 = vector.load %arg10[%c0_87, %c0_88] : memref<128x256xbf16, #tpu.memory_space<vmem>>, vector<128x256xbf16>
    %cst_89 = arith.constant dense<0.000000e+00> : vector<8x256xf32>
    %152 = tpu.matmul %150, %151, %cst_89 {dimension_numbers = #tpu.dot_dimension_numbers<[1], [0], [0], [1], [0, 0, 1, 1], [], []>} : vector<8x128xbf16>, vector<128x256xbf16>, vector<8x256xf32> -> vector<8x256xf32>
    %c0_90 = arith.constant 0 : index
    %c0_91 = arith.constant 0 : index
    %153 = vector.load %arg12[%c0_90, %c0_91] : memref<128x128xbf16, #tpu.memory_space<vmem>>, vector<128x128xbf16>
    %cst_92 = arith.constant dense<0.000000e+00> : vector<8x128xf32>
    %154 = tpu.matmul %150, %153, %cst_92 {dimension_numbers = #tpu.dot_dimension_numbers<[1], [0], [0], [1], [0, 0, 1, 1], [], []>} : vector<8x128xbf16>, vector<128x128xbf16>, vector<8x128xf32> -> vector<8x128xf32>
    %c0_93 = arith.constant 0 : index
    %c0_94 = arith.constant 0 : index
    %155 = vector.load %arg9[%c0_93, %c0_94] : memref<128x256xbf16, #tpu.memory_space<vmem>>, vector<128x256xbf16>
    %cst_95 = arith.constant dense<0.000000e+00> : vector<8x256xf32>
    %156 = tpu.matmul %147, %155, %cst_95 {dimension_numbers = #tpu.dot_dimension_numbers<[1], [0], [0], [1], [0, 0, 1, 1], [], []>} : vector<8x128xbf16>, vector<128x256xbf16>, vector<8x256xf32> -> vector<8x256xf32>
    %157 = arith.addf %156, %152 : vector<8x256xf32>
    %c0_96 = arith.constant 0 : index
    %c0_97 = arith.constant 0 : index
    %158 = vector.load %arg13[%c0_96, %c0_97] : memref<1x256xf32, #tpu.memory_space<vmem>>, vector<1x256xf32>
    %159 = vector.broadcast %158 : vector<1x256xf32> to vector<8x256xf32>
    %160 = arith.addf %157, %159 : vector<8x256xf32>
    %161 = arith.negf %160 : vector<8x256xf32>
    %162 = math.exp %161 : vector<8x256xf32>
    %cst_98 = arith.constant 1.000000e+00 : f32
    %163 = vector.broadcast %cst_98 : f32 to vector<8x256xf32>
    %164 = arith.addf %163, %162 : vector<8x256xf32>
    %165 = arith.divf %163, %164 : vector<8x256xf32>
    %166 = vector.extract_strided_slice %165 {offsets = [0, 0], sizes = [8, 128], strides = [1, 1]} : vector<8x256xf32> to vector<8x128xf32>
    %167 = vector.extract_strided_slice %165 {offsets = [0, 128], sizes = [8, 128], strides = [1, 1]} : vector<8x256xf32> to vector<8x128xf32>
    %c0_99 = arith.constant 0 : index
    %c0_100 = arith.constant 0 : index
    %168 = vector.load %arg11[%c0_99, %c0_100] : memref<128x128xbf16, #tpu.memory_space<vmem>>, vector<128x128xbf16>
    %cst_101 = arith.constant dense<0.000000e+00> : vector<8x128xf32>
    %169 = tpu.matmul %147, %168, %cst_101 {dimension_numbers = #tpu.dot_dimension_numbers<[1], [0], [0], [1], [0, 0, 1, 1], [], []>} : vector<8x128xbf16>, vector<128x128xbf16>, vector<8x128xf32> -> vector<8x128xf32>
    %c0_102 = arith.constant 0 : index
    %c0_103 = arith.constant 0 : index
    %170 = vector.load %arg14[%c0_102, %c0_103] : memref<1x128xf32, #tpu.memory_space<vmem>>, vector<1x128xf32>
    %171 = vector.broadcast %170 : vector<1x128xf32> to vector<8x128xf32>
    %172 = arith.addf %169, %171 : vector<8x128xf32>
    %c0_104 = arith.constant 0 : index
    %c0_105 = arith.constant 0 : index
    %173 = vector.load %arg15[%c0_104, %c0_105] : memref<1x128xf32, #tpu.memory_space<vmem>>, vector<1x128xf32>
    %174 = vector.broadcast %173 : vector<1x128xf32> to vector<8x128xf32>
    %175 = arith.addf %154, %174 : vector<8x128xf32>
    %176 = arith.mulf %166, %175 : vector<8x128xf32>
    %177 = arith.addf %172, %176 : vector<8x128xf32>
    %178 = math.tanh %177 : vector<8x128xf32>
    %cst_106 = arith.constant 1.000000e+00 : f32
    %179 = vector.broadcast %cst_106 : f32 to vector<8x128xf32>
    %180 = arith.subf %179, %167 : vector<8x128xf32>
    %181 = arith.mulf %180, %178 : vector<8x128xf32>
    %182 = arith.mulf %167, %149 : vector<8x128xf32>
    %183 = arith.addf %181, %182 : vector<8x128xf32>
    %c1_107 = arith.constant 1 : index
    %c0_108 = arith.constant 0 : index
    %c0_109 = arith.constant 0 : index
    %184 = vector.load %arg27[%c1_107, %c0_108, %c0_109] : memref<3x8x128xf32, #tpu.memory_space<vmem>>, vector<1x8x128xf32>
    %185 = vector.shape_cast %184 : vector<1x8x128xf32> to vector<8x128xf32>
    %186 = vector.shape_cast %183 : vector<8x128xf32> to vector<1x8x128xf32>
    tpu.vector_store %arg27[%c1_107, %c0_108, %c0_109], %186 {strides = array<i32>} : memref<3x8x128xf32, #tpu.memory_space<vmem>>, vector<1x8x128xf32>,
    %187 = arith.truncf %183 : vector<8x128xf32> to vector<8x128xbf16>
    %c2_110 = arith.constant 2 : index
    %c0_111 = arith.constant 0 : index
    %c0_112 = arith.constant 0 : index
    %188 = vector.load %arg25[%c2_110, %c0_111, %c0_112] : memref<3x8x128xf32, #tpu.memory_space<vmem>>, vector<1x8x128xf32>
    %189 = vector.shape_cast %188 : vector<1x8x128xf32> to vector<8x128xf32>
    %190 = arith.truncf %189 : vector<8x128xf32> to vector<8x128xbf16>
    %c0_113 = arith.constant 0 : index
    %c0_114 = arith.constant 0 : index
    %191 = vector.load %arg17[%c0_113, %c0_114] : memref<128x256xbf16, #tpu.memory_space<vmem>>, vector<128x256xbf16>
    %cst_115 = arith.constant dense<0.000000e+00> : vector<8x256xf32>
    %192 = tpu.matmul %190, %191, %cst_115 {dimension_numbers = #tpu.dot_dimension_numbers<[1], [0], [0], [1], [0, 0, 1, 1], [], []>} : vector<8x128xbf16>, vector<128x256xbf16>, vector<8x256xf32> -> vector<8x256xf32>
    %c0_116 = arith.constant 0 : index
    %c0_117 = arith.constant 0 : index
    %193 = vector.load %arg19[%c0_116, %c0_117] : memref<128x128xbf16, #tpu.memory_space<vmem>>, vector<128x128xbf16>
    %cst_118 = arith.constant dense<0.000000e+00> : vector<8x128xf32>
    %194 = tpu.matmul %190, %193, %cst_118 {dimension_numbers = #tpu.dot_dimension_numbers<[1], [0], [0], [1], [0, 0, 1, 1], [], []>} : vector<8x128xbf16>, vector<128x128xbf16>, vector<8x128xf32> -> vector<8x128xf32>
    %c0_119 = arith.constant 0 : index
    %c0_120 = arith.constant 0 : index
    %195 = vector.load %arg16[%c0_119, %c0_120] : memref<128x256xbf16, #tpu.memory_space<vmem>>, vector<128x256xbf16>
    %cst_121 = arith.constant dense<0.000000e+00> : vector<8x256xf32>
    %196 = tpu.matmul %187, %195, %cst_121 {dimension_numbers = #tpu.dot_dimension_numbers<[1], [0], [0], [1], [0, 0, 1, 1], [], []>} : vector<8x128xbf16>, vector<128x256xbf16>, vector<8x256xf32> -> vector<8x256xf32>
    %197 = arith.addf %196, %192 : vector<8x256xf32>
    %c0_122 = arith.constant 0 : index
    %c0_123 = arith.constant 0 : index
    %198 = vector.load %arg20[%c0_122, %c0_123] : memref<1x256xf32, #tpu.memory_space<vmem>>, vector<1x256xf32>
    %199 = vector.broadcast %198 : vector<1x256xf32> to vector<8x256xf32>
    %200 = arith.addf %197, %199 : vector<8x256xf32>
    %201 = arith.negf %200 : vector<8x256xf32>
    %202 = math.exp %201 : vector<8x256xf32>
    %cst_124 = arith.constant 1.000000e+00 : f32
    %203 = vector.broadcast %cst_124 : f32 to vector<8x256xf32>
    %204 = arith.addf %203, %202 : vector<8x256xf32>
    %205 = arith.divf %203, %204 : vector<8x256xf32>
    %206 = vector.extract_strided_slice %205 {offsets = [0, 0], sizes = [8, 128], strides = [1, 1]} : vector<8x256xf32> to vector<8x128xf32>
    %207 = vector.extract_strided_slice %205 {offsets = [0, 128], sizes = [8, 128], strides = [1, 1]} : vector<8x256xf32> to vector<8x128xf32>
    %c0_125 = arith.constant 0 : index
    %c0_126 = arith.constant 0 : index
    %208 = vector.load %arg18[%c0_125, %c0_126] : memref<128x128xbf16, #tpu.memory_space<vmem>>, vector<128x128xbf16>
    %cst_127 = arith.constant dense<0.000000e+00> : vector<8x128xf32>
    %209 = tpu.matmul %187, %208, %cst_127 {dimension_numbers = #tpu.dot_dimension_numbers<[1], [0], [0], [1], [0, 0, 1, 1], [], []>} : vector<8x128xbf16>, vector<128x128xbf16>, vector<8x128xf32> -> vector<8x128xf32>
    %c0_128 = arith.constant 0 : index
    %c0_129 = arith.constant 0 : index
    %210 = vector.load %arg21[%c0_128, %c0_129] : memref<1x128xf32, #tpu.memory_space<vmem>>, vector<1x128xf32>
    %211 = vector.broadcast %210 : vector<1x128xf32> to vector<8x128xf32>
    %212 = arith.addf %209, %211 : vector<8x128xf32>
    %c0_130 = arith.constant 0 : index
    %c0_131 = arith.constant 0 : index
    %213 = vector.load %arg22[%c0_130, %c0_131] : memref<1x128xf32, #tpu.memory_space<vmem>>, vector<1x128xf32>
    %214 = vector.broadcast %213 : vector<1x128xf32> to vector<8x128xf32>
    %215 = arith.addf %194, %214 : vector<8x128xf32>
    %216 = arith.mulf %206, %215 : vector<8x128xf32>
    %217 = arith.addf %212, %216 : vector<8x128xf32>
    %218 = math.tanh %217 : vector<8x128xf32>
    %cst_132 = arith.constant 1.000000e+00 : f32
    %219 = vector.broadcast %cst_132 : f32 to vector<8x128xf32>
    %220 = arith.subf %219, %207 : vector<8x128xf32>
    %221 = arith.mulf %220, %218 : vector<8x128xf32>
    %222 = arith.mulf %207, %189 : vector<8x128xf32>
    %223 = arith.addf %221, %222 : vector<8x128xf32>
    %c2_133 = arith.constant 2 : index
    %c0_134 = arith.constant 0 : index
    %c0_135 = arith.constant 0 : index
    %224 = vector.load %arg27[%c2_133, %c0_134, %c0_135] : memref<3x8x128xf32, #tpu.memory_space<vmem>>, vector<1x8x128xf32>
    %225 = vector.shape_cast %224 : vector<1x8x128xf32> to vector<8x128xf32>
    %226 = vector.shape_cast %223 : vector<8x128xf32> to vector<1x8x128xf32>
    tpu.vector_store %arg27[%c2_133, %c0_134, %c0_135], %226 {strides = array<i32>} : memref<3x8x128xf32, #tpu.memory_space<vmem>>, vector<1x8x128xf32>,
    %c0_i32_136 = arith.constant 0 : i32
    %227 = tpu.memref_slice %arg31[%c0_i32_136] : memref<1x!tpu.dma_semaphore, #tpu.memory_space<semaphore_mem>> -> memref<1x!tpu.dma_semaphore, #tpu.memory_space<semaphore_mem>>
    %228 = tpu.memref_squeeze %227 : memref<1x!tpu.dma_semaphore, #tpu.memory_space<semaphore_mem>> -> memref<!tpu.dma_semaphore, #tpu.memory_space<semaphore_mem>>
    tpu.wait_dma2 semaphore(%228 : memref<!tpu.dma_semaphore, #tpu.memory_space<semaphore_mem>>) src(%arg23 : memref<128x1024xbf16, #tpu.memory_space<any>>) dst(%arg29 : memref<128x1024xbf16, #tpu.memory_space<vmem>>)
    %229 = arith.truncf %223 : vector<8x128xf32> to vector<8x128xbf16>
    %c0_137 = arith.constant 0 : index
    %c0_138 = arith.constant 0 : index
    %230 = vector.load %arg29[%c0_137, %c0_138] : memref<128x1024xbf16, #tpu.memory_space<vmem>>, vector<128x1024xbf16>
    %cst_139 = arith.constant dense<0.000000e+00> : vector<8x1024xf32>
    %231 = tpu.matmul %229, %230, %cst_139 {dimension_numbers = #tpu.dot_dimension_numbers<[1], [0], [0], [1], [0, 0, 1, 1], [], []>} : vector<8x128xbf16>, vector<128x1024xbf16>, vector<8x1024xf32> -> vector<8x1024xf32>
    %c0_140 = arith.constant 0 : index
    %c0_141 = arith.constant 0 : index
    %232 = vector.load %arg24[%c0_140, %c0_141] : memref<1x1024xf32, #tpu.memory_space<vmem>>, vector<1x1024xf32>
    %233 = vector.broadcast %232 : vector<1x1024xf32> to vector<8x1024xf32>
    %234 = arith.addf %231, %233 : vector<8x1024xf32>
    %c0_142 = arith.constant 0 : index
    %c0_143 = arith.constant 0 : index
    %235 = vector.load %arg26[%c0_142, %c0_143] : memref<8x1024xf32, #tpu.memory_space<vmem>>, vector<8x1024xf32>
    tpu.vector_store %arg26[%c0_142, %c0_143], %234 {strides = array<i32>} : memref<8x1024xf32, #tpu.memory_space<vmem>>, vector<8x1024xf32>,
    return
  }
}

</mosaic_0001>

<bundles_post_ra>
// kernel: net_forward.1
= control target key start
LH: loop header
LB: loop body
LE: loop exit
PB: predicated region body
PF: predicated region fallthrough
CT: control target
= control target key end

     0   :  { %s4401_s0 = inlined_call_operand.vmem [shape: s32[8], index: 0, kind: input, shape index: {}]   ;;  %s4402_s1 = inlined_call_operand.hbm [shape: f32[1024,128], index: 1, kind: input, shape index: {}]   ;;  %s4403_s2 = inlined_call_operand.hbm [shape: bf16[128,256], index: 2, kind: input, shape index: {}]   ;;  %s4404_s3 = inlined_call_operand.hbm [shape: bf16[128,256], index: 3, kind: input, shape index: {}]   ;;  %s4405_s4 = inlined_call_operand.vmem [shape: bf16[128,128], index: 4, kind: input, shape index: {}]   ;;  %s4406_s5 = inlined_call_operand.hbm [shape: bf16[128,128], index: 5, kind: input, shape index: {}]   ;;  %s4407_s6 = inlined_call_operand.vmem [shape: f32[1,256], index: 6, kind: input, shape index: {}]   ;;  %s4408_s7 = inlined_call_operand.vmem [shape: f32[1,128], index: 7, kind: input, shape index: {}]   ;;  %s4409_s8 = inlined_call_operand.vmem [shape: f32[1,128], index: 8, kind: input, shape index: {}]   ;;  %s4410_s9 = inlined_call_operand.hbm [shape: bf16[128,256], index: 9, kind: input, shape index: {}]   ;;  %s4411_s10 = inlined_call_operand.hbm [shape: bf16[128,256], index: 10, kind: input, shape index: {}]   ;;  %s4412_s11 = inlined_call_operand.hbm [shape: bf16[128,128], index: 11, kind: input, shape index: {}]   ;;  %s4413_s12 = inlined_call_operand.hbm [shape: bf16[128,128], index: 12, kind: input, shape index: {}]   ;;  %s4414_s13 = inlined_call_operand.vmem [shape: f32[1,256], index: 13, kind: input, shape index: {}]   ;;  %s4415_s14 = inlined_call_operand.vmem [shape: f32[1,128], index: 14, kind: input, shape index: {}]   ;;  %s4416_s15 = inlined_call_operand.vmem [shape: f32[1,128], index: 15, kind: input, shape index: {}]   ;;  %s4417_s16 = inlined_call_operand.hbm [shape: bf16[128,256], index: 16, kind: input, shape index: {}]   ;;  %s4418_s17 = inlined_call_operand.hbm [shape: bf16[128,256], index: 17, kind: input, shape index: {}]   ;;  %s4419_s18 = inlined_call_operand.hbm [shape: bf16[128,128], index: 18, kind: input, shape index: {}]   ;;  %s4420_s19 = inlined_call_operand.hbm [shape: bf16[128,128], index: 19, kind: input, shape index: {}]   ;;  %s4421_s20 = inlined_call_operand.vmem [shape: f32[1,256], index: 20, kind: input, shape index: {}]   ;;  %s4422_s21 = inlined_call_operand.vmem [shape: f32[1,128], index: 21, kind: input, shape index: {}]   ;;  %s4423_s22 = inlined_call_operand.vmem [shape: f32[1,128], index: 22, kind: input, shape index: {}]   ;;  %s4424_s23 = inlined_call_operand.hbm [shape: bf16[128,1024], index: 23, kind: input, shape index: {}]   ;;  %s4425_s24 = inlined_call_operand.vmem [shape: f32[1,1024], index: 24, kind: input, shape index: {}]   ;;  %s4426_s25 = inlined_call_operand.hbm [shape: f32[3,8,128], index: 25, kind: input, shape index: {}, may-alias: {25,27}]   ;;  %s4427_s26 = inlined_call_operand.hbm [shape: f32[8,1024], index: 26, kind: output, shape index: {0}]   ;;  %s4428_s27 = inlined_call_operand.hbm [shape: f32[3,8,128], index: 27, kind: output, shape index: {1}, may-alias: {25,27}]  }
   0x1   :  { %4443 = sst [smem:[#allocation70_spill]] %s4401_s0 }
   0x2   :  { %4444 = sst [smem:[#allocation71_spill]] %s4402_s1 }
   0x3   :  { %4445 = sst [smem:[#allocation72_spill]] %s4403_s2 }
   0x4   :  { %4446 = sst [smem:[#allocation73_spill]] %s4404_s3 }
   0x5   :  { %4447 = sst [smem:[#allocation74_spill]] %s4405_s4 }
   0x6   :  { %4448 = sst [smem:[#allocation75_spill]] %s4406_s5 }
   0x7   :  { %4449 = sst [smem:[#allocation76_spill]] %s4407_s6 }
   0x8   :  { %4450 = sst [smem:[#allocation77_spill]] %s4408_s7 }
   0x9   :  { %4451 = sst [smem:[#allocation78_spill]] %s4409_s8 }
   0xa   :  { %4452 = sst [smem:[#allocation79_spill]] %s4410_s9 }
   0xb   :  { %4453 = sst [smem:[#allocation80_spill]] %s4411_s10 }
   0xc   :  { %4454 = sst [smem:[#allocation81_spill]] %s4412_s11 }
   0xd   :  { %4455 = sst [smem:[#allocation82_spill]] %s4425_s24 }
   0xe   :  { %4456 = sst [smem:[#allocation83_spill]] %s4427_s26 }
   0xf   :  { %4457 = sst [smem:[#allocation84_spill]] %s4428_s27 }
  0x10   :  { %33 = vsyncpa [#allocation9], 0 }
  0x11   :  { %34 = vsyncpa [#allocation7], 0 }
  0x12   :  { %35 = vsyncpa [#allocation12], 0 }
  0x13   :  { %36 = vsyncpa [#allocation15], 0 }
  0x14   :  { %37 = vsyncpa [#allocation18], 0 }
  0x15   :  { %38 = vsyncpa [#allocation21], 0 }
  0x16   :  { %39 = vsyncpa [#allocation24], 0 }
  0x17   :  { %40 = vsyncpa [#allocation27], 0 }
  0x18   :  { %41 = vsyncpa [#allocation8], 0 }
  0x19   :  { %42 = vsyncpa [#allocation30], 0  ;;  %s3595_s7 = smov [#allocation11]   ;;  %s3596_s8 = smov [#allocation14]  }
  0x1a   :  { %s70_s4 = sshll.u32 %s3595_s7, 4  ;;  %s102_s30 = sshll.u32 %s3596_s8, 4  ;;  %s71_s4 = int_to_ptr.vmem [resolvable:$true] %s70_s4  ;;  %s3771_s30 = int_to_ptr.vmem [resolvable:$true] %s102_s30 }
  0x1b   :  { %s4458_s28 = sld [smem:[#allocation73_spill]] }
  0x21   :  { %s3045_s0 = scalar_lea.hbm %s4458_s28, 2048 }
  0x22   :  { %p3046_p0 = scmp.ne.s32.totalorder %s4458_s28, %s3045_s0  ;;  %p3049_p1 = scmp.lt.u32.totalorder %s3045_s0, %s4458_s28 }
  0x24   :  { %p3051_p2 = pnand %p3049_p1, %p3046_p0 }
  0x26   :  { %3054 = shalt.err (!%p3051_p2)
}
  0x27   :  { %s3055_s11 = scalar_lea.vmem %s71_s4, 2048  ;;  %p3060_p4 = scmp.lt.s32.totalorder %s71_s4, %s71_s4 }
  0x28   :  { %p3056_p3 = scmp.ne.s32.totalorder %s71_s4, %s3055_s11  ;;  %p3061_p5 = scmp.lt.s32.totalorder %s3055_s11, %s3055_s11 }
  0x2a   :  { %p3062_p6 = por %p3061_p5, %p3060_p4 }
  0x2c   :  { %p3063_p7 = pnand %p3062_p6, %p3056_p3 }
  0x2e   :  { %3066 = shalt.err (!%p3063_p7)
}
  0x2f   :  { %s3597_s2 = smov 128   ;;  %s3598_s3 = smov 8  }
  0x30   :  { %76 = dma.hbm_to_vmem [thread:$0]  %s4458_s28, 2048, %s71_s4, [#allocation12], %s3597_s2, %s3597_s2, %s3598_s3  }
  0x31   :  { %s4459_s0 = sld [smem:[#allocation79_spill]] }
  0x37   :  { %s3067_s10 = scalar_lea.hbm %s4459_s0, 2048 }
  0x38   :  { %p3068_p8 = scmp.ne.s32.totalorder %s4459_s0, %s3067_s10  ;;  %p3071_p9 = scmp.lt.u32.totalorder %s3067_s10, %s4459_s0 }
  0x3a   :  { %p3073_p10 = pnand %p3071_p9, %p3068_p8 }
  0x3c   :  { %3076 = shalt.err (!%p3073_p10)
}
  0x3d   :  { %s3077_s26 = scalar_lea.vmem %s3771_s30, 2048  ;;  %p3082_p12 = scmp.lt.s32.totalorder %s3771_s30, %s3771_s30 }
  0x3e   :  { %p3078_p11 = scmp.ne.s32.totalorder %s3771_s30, %s3077_s26  ;;  %p3083_p13 = scmp.lt.s32.totalorder %s3077_s26, %s3077_s26 }
  0x40   :  { %p3084_p0 = por %p3083_p13, %p3082_p12 }
  0x42   :  { %p3085_p1 = pnand %p3084_p0, %p3078_p11 }
  0x44   :  { %3088 = shalt.err (!%p3085_p1)
}
  0x45   :  { %108 = dma.hbm_to_vmem [thread:$0]  %s4459_s0, 2048, %s3771_s30, [#allocation15], %s3597_s2, %s3597_s2, %s3598_s3  }
  0x46   :  { %s3599_s7 = smov [#allocation17]   ;;  %s3600_s9 = smov [#allocation20]  }
  0x47   :  { %s126_s8 = sshll.u32 %s3599_s7, 4  ;;  %s156_s5 = sshll.u32 %s3600_s9, 4  ;;  %s127_s8 = int_to_ptr.vmem [resolvable:$true] %s126_s8  ;;  %s3808_s5 = int_to_ptr.vmem [resolvable:$true] %s156_s5 }
  0x48   :  { %s4460_s29 = sld [smem:[#allocation81_spill]] }
  0x4e   :  { %s3089_s1 = scalar_lea.hbm %s4460_s29, 1024 }
  0x4f   :  { %p3090_p2 = scmp.ne.s32.totalorder %s4460_s29, %s3089_s1  ;;  %p3093_p3 = scmp.lt.u32.totalorder %s3089_s1, %s4460_s29 }
  0x51   :  { %p3095_p4 = pnand %p3093_p3, %p3090_p2 }
  0x53   :  { %3098 = shalt.err (!%p3095_p4)
}
  0x54   :  { %s3099_s30 = scalar_lea.vmem %s127_s8, 1024  ;;  %p3104_p6 = scmp.lt.s32.totalorder %s127_s8, %s127_s8 }
  0x55   :  { %p3100_p5 = scmp.ne.s32.totalorder %s127_s8, %s3099_s30  ;;  %p3105_p7 = scmp.lt.s32.totalorder %s3099_s30, %s3099_s30 }
  0x57   :  { %p3106_p8 = por %p3105_p7, %p3104_p6 }
  0x59   :  { %p3107_p9 = pnand %p3106_p8, %p3100_p5 }
  0x5b   :  { %3110 = shalt.err (!%p3107_p9)
}
  0x5c   :  { %s4439_s0 = smov 64   ;;  %s4441_s4 = smov 4  }
  0x5d   :  { %132 = dma.hbm_to_vmem [thread:$0]  %s4460_s29, 1024, %s127_s8, [#allocation18], %s4439_s0, %s4439_s0, %s4441_s4  }
  0x5e   :  { %s3111_s9 = scalar_lea.hbm %s4417_s16, 2048 }
  0x5f   :  { %p3112_p10 = scmp.ne.s32.totalorder %s4417_s16, %s3111_s9  ;;  %p3115_p11 = scmp.lt.u32.totalorder %s3111_s9, %s4417_s16 }
  0x61   :  { %p3117_p12 = pnand %p3115_p11, %p3112_p10 }
  0x63   :  { %3120 = shalt.err (!%p3117_p12)
}
  0x64   :  { %s3121_s11 = scalar_lea.vmem %s3808_s5, 2048  ;;  %p3126_p0 = scmp.lt.s32.totalorder %s3808_s5, %s3808_s5 }
  0x65   :  { %p3122_p13 = scmp.ne.s32.totalorder %s3808_s5, %s3121_s11  ;;  %p3127_p1 = scmp.lt.s32.totalorder %s3121_s11, %s3121_s11 }
  0x67   :  { %p3128_p2 = por %p3127_p1, %p3126_p0 }
  0x69   :  { %p3129_p3 = pnand %p3128_p2, %p3122_p13 }
  0x6b   :  { %3132 = shalt.err (!%p3129_p3)
}
  0x6c   :  { %162 = dma.hbm_to_vmem [thread:$0]  %s4417_s16, 2048, %s3808_s5, [#allocation21], %s3597_s2, %s3597_s2, %s3598_s3  }
  0x6d   :  { %s4461_s7 = sld [smem:[#allocation70_spill]]  ;;  %s3603_s27 = smov [#allocation23]  }
  0x6e   :  { %s180_s9 = sshll.u32 %s3603_s27, 4  ;;  %s3133_s1 = scalar_lea.hbm %s4419_s18, 1024  ;;  %s181_s9 = int_to_ptr.vmem [resolvable:$true] %s180_s9 }
  0x6f   :  { %p3134_p4 = scmp.ne.s32.totalorder %s4419_s18, %s3133_s1  ;;  %p3137_p5 = scmp.lt.u32.totalorder %s3133_s1, %s4419_s18 }
  0x71   :  { %p3139_p6 = pnand %p3137_p5, %p3134_p4 }
  0x73   :  { %s49_s24 = sshll.u32 %s4461_s7, 4  ;;  %s50_s24 = int_to_ptr.vmem [resolvable:$true] %s49_s24 }
  0x74   :  { %3142 = shalt.err (!%p3139_p6)
}
  0x75   :  { %s3143_s16 = scalar_lea.vmem %s181_s9, 1024  ;;  %p3148_p8 = scmp.lt.s32.totalorder %s181_s9, %s181_s9 }
  0x76   :  { %p3144_p7 = scmp.ne.s32.totalorder %s181_s9, %s3143_s16  ;;  %p3149_p9 = scmp.lt.s32.totalorder %s3143_s16, %s3143_s16 }
  0x78   :  { %p3150_p10 = por %p3149_p9, %p3148_p8 }
  0x7a   :  { %p3151_p11 = pnand %p3150_p10, %p3144_p7 }
  0x7c   :  { %3154 = shalt.err (!%p3151_p11)
}
  0x7d   :  { %s4462_s5 = smov 4   ;;  %s4463_s8 = smov 64  }
  0x7e   :  { %186 = dma.hbm_to_vmem [thread:$0]  %s4419_s18, 1024, %s181_s9, [#allocation24], %s4463_s8, %s4463_s8, %s4462_s5  }
  0x7f   :  { %s3155_s28 = scalar_lea.vmem %s50_s24, 16  ;;  %p3160_p13 = scmp.lt.s32.totalorder %s50_s24, %s50_s24 }
  0x80   :  { %p3156_p12 = scmp.ne.s32.totalorder %s50_s24, %s3155_s28  ;;  %p3161_p0 = scmp.lt.s32.totalorder %s3155_s28, %s3155_s28 }
  0x82   :  { %p3162_p1 = por %p3161_p0, %p3160_p13 }
  0x84   :  { %p3163_p2 = pnand %p3162_p1, %p3156_p12 }
  0x86   :  { %3166 = shalt.err (!%p3163_p2)
}
  0x87   :  { %s3604_s0 = smov [#allocation6]   ;;  %s3605_s4 = smov [#allocation10]  }
  0x88   :  { %52 = dma.vmem_to_smem %s50_s24, 16, %s3604_s0, [#allocation9]  }
  0x89   :  { %s58_s7 = sshll.u32 %s3605_s4, 4  ;;  %s3606_s27 = smov [#allocation13]   ;;  %s59_s7 = int_to_ptr.vmem [resolvable:$true] %s58_s7 }
  0x8a   :  { %s84_s10 = sshll.u32 %s3606_s27, 4  ;;  %s4464_s6 = sld [smem:[#allocation72_spill]]  ;;  %s3863_s10 = int_to_ptr.vmem [resolvable:$true] %s84_s10 }
  0x90   :  { %s3167_s18 = scalar_lea.hbm %s4464_s6, 2048 }
  0x91   :  { %p3168_p3 = scmp.ne.s32.totalorder %s4464_s6, %s3167_s18  ;;  %p3171_p4 = scmp.lt.u32.totalorder %s3167_s18, %s4464_s6 }
  0x93   :  { %p3173_p5 = pnand %p3171_p4, %p3168_p3 }
  0x95   :  { %3176 = shalt.err (!%p3173_p5)
}
  0x96   :  { %s3177_s24 = scalar_lea.vmem %s59_s7, 2048  ;;  %p3182_p7 = scmp.lt.s32.totalorder %s59_s7, %s59_s7 }
  0x97   :  { %p3178_p6 = scmp.ne.s32.totalorder %s59_s7, %s3177_s24  ;;  %p3183_p8 = scmp.lt.s32.totalorder %s3177_s24, %s3177_s24 }
  0x99   :  { %p3184_p9 = por %p3183_p8, %p3182_p7 }
  0x9b   :  { %p3185_p10 = pnand %p3184_p9, %p3178_p6 }
  0x9d   :  { %3188 = shalt.err (!%p3185_p10)
}
  0x9e   :  { %64 = dma.hbm_to_vmem [thread:$0]  %s4464_s6, 2048, %s59_s7, [#allocation7], %s3597_s2, %s3597_s2, %s3598_s3  }
  0x9f   :  { %s4465_s27 = sld [smem:[#allocation75_spill]] }
  0xa5   :  { %s3189_s26 = scalar_lea.hbm %s4465_s27, 1024 }
  0xa6   :  { %p3190_p11 = scmp.ne.s32.totalorder %s4465_s27, %s3189_s26  ;;  %p3193_p12 = scmp.lt.u32.totalorder %s3189_s26, %s4465_s27 }
  0xa8   :  { %p3195_p13 = pnand %p3193_p12, %p3190_p11 }
  0xaa   :  { %3198 = shalt.err (!%p3195_p13)
}
  0xab   :  { %s3199_s16 = scalar_lea.vmem %s3863_s10, 1024  ;;  %p3204_p1 = scmp.lt.s32.totalorder %s3863_s10, %s3863_s10 }
  0xac   :  { %p3200_p0 = scmp.ne.s32.totalorder %s3863_s10, %s3199_s16  ;;  %p3205_p2 = scmp.lt.s32.totalorder %s3199_s16, %s3199_s16 }
  0xae   :  { %p3206_p3 = por %p3205_p2, %p3204_p1 }
  0xb0   :  { %p3207_p4 = pnand %p3206_p3, %p3200_p0 }
  0xb2   :  { %3210 = shalt.err (!%p3207_p4)
}
  0xb3   :  { %90 = dma.hbm_to_vmem [thread:$0]  %s4465_s27, 1024, %s3863_s10, [#allocation12], %s4463_s8, %s4463_s8, %s4462_s5  }
  0xb4   :  { %s3607_s29 = smov [#allocation16]   ;;  %s3608_s30 = smov [#allocation19]  }
  0xb5   :  { %s114_s24 = sshll.u32 %s3607_s29, 4  ;;  %s138_s28 = sshll.u32 %s3608_s30, 4  ;;  %s115_s24 = int_to_ptr.vmem [resolvable:$true] %s114_s24  ;;  %s3900_s28 = int_to_ptr.vmem [resolvable:$true] %s138_s28 }
  0xb6   :  { %s4466_s26 = sld [smem:[#allocation80_spill]] }
  0xbc   :  { %s3211_s1 = scalar_lea.hbm %s4466_s26, 2048 }
  0xbd   :  { %p3212_p5 = scmp.ne.s32.totalorder %s4466_s26, %s3211_s1  ;;  %p3215_p6 = scmp.lt.u32.totalorder %s3211_s1, %s4466_s26 }
  0xbf   :  { %p3217_p7 = pnand %p3215_p6, %p3212_p5 }
  0xc1   :  { %3220 = shalt.err (!%p3217_p7)
}
  0xc2   :  { %s3221_s10 = scalar_lea.vmem %s115_s24, 2048  ;;  %p3226_p9 = scmp.lt.s32.totalorder %s115_s24, %s115_s24 }
  0xc3   :  { %p3222_p8 = scmp.ne.s32.totalorder %s115_s24, %s3221_s10  ;;  %p3227_p10 = scmp.lt.s32.totalorder %s3221_s10, %s3221_s10 }
  0xc5   :  { %p3228_p11 = por %p3227_p10, %p3226_p9 }
  0xc7   :  { %p3229_p12 = pnand %p3228_p11, %p3222_p8 }
  0xc9   :  { %3232 = shalt.err (!%p3229_p12)
}
  0xca   :  { %120 = dma.hbm_to_vmem [thread:$0]  %s4466_s26, 2048, %s115_s24, [#allocation15], %s3597_s2, %s3597_s2, %s3598_s3  }
  0xcb   :  { %s3233_s30 = scalar_lea.hbm %s4413_s12, 1024 }
  0xcc   :  { %p3234_p13 = scmp.ne.s32.totalorder %s4413_s12, %s3233_s30  ;;  %p3237_p0 = scmp.lt.u32.totalorder %s3233_s30, %s4413_s12 }
  0xce   :  { %p3239_p1 = pnand %p3237_p0, %p3234_p13 }
  0xd0   :  { %3242 = shalt.err (!%p3239_p1)
}
  0xd1   :  { %s3243_s9 = scalar_lea.vmem %s3900_s28, 1024  ;;  %p3248_p3 = scmp.lt.s32.totalorder %s3900_s28, %s3900_s28 }
  0xd2   :  { %p3244_p2 = scmp.ne.s32.totalorder %s3900_s28, %s3243_s9  ;;  %p3249_p4 = scmp.lt.s32.totalorder %s3243_s9, %s3243_s9 }
  0xd4   :  { %p3250_p5 = por %p3249_p4, %p3248_p3 }
  0xd6   :  { %p3251_p6 = pnand %p3250_p5, %p3244_p2 }
  0xd8   :  { %3254 = shalt.err (!%p3251_p6)
}
  0xd9   :  { %144 = dma.hbm_to_vmem [thread:$0]  %s4413_s12, 1024, %s3900_s28, [#allocation18], %s4463_s8, %s4463_s8, %s4462_s5  }
  0xda   :  { %s3609_s11 = smov [#allocation22]   ;;  %s3610_s10 = smov [#allocation25]  }
  0xdb   :  { %s168_s16 = sshll.u32 %s3609_s11, 4  ;;  %s192_s27 = sshll.u32 %s3610_s10, 4  ;;  %s169_s16 = int_to_ptr.vmem [resolvable:$true] %s168_s16  ;;  %s3937_s27 = int_to_ptr.vmem [resolvable:$true] %s192_s27 }
  0xdc   :  { %s3255_s29 = scalar_lea.hbm %s4418_s17, 2048 }
  0xdd   :  { %p3256_p7 = scmp.ne.s32.totalorder %s4418_s17, %s3255_s29  ;;  %p3259_p8 = scmp.lt.u32.totalorder %s3255_s29, %s4418_s17 }
  0xdf   :  { %p3261_p9 = pnand %p3259_p8, %p3256_p7 }
  0xe1   :  { %3264 = shalt.err (!%p3261_p9)
}
  0xe2   :  { %s3265_s12 = scalar_lea.vmem %s169_s16, 2048  ;;  %p3270_p11 = scmp.lt.s32.totalorder %s169_s16, %s169_s16 }
  0xe3   :  { %p3266_p10 = scmp.ne.s32.totalorder %s169_s16, %s3265_s12  ;;  %p3271_p12 = scmp.lt.s32.totalorder %s3265_s12, %s3265_s12 }
  0xe5   :  { %p3272_p13 = por %p3271_p12, %p3270_p11 }
  0xe7   :  { %p3273_p0 = pnand %p3272_p13, %p3266_p10 }
  0xe9   :  { %3276 = shalt.err (!%p3273_p0)
}
  0xea   :  { %174 = dma.hbm_to_vmem [thread:$0]  %s4418_s17, 2048, %s169_s16, [#allocation21], %s3597_s2, %s3597_s2, %s3598_s3  }
  0xeb   :  { %s3277_s26 = scalar_lea.hbm %s4420_s19, 1024 }
  0xec   :  { %p3278_p1 = scmp.ne.s32.totalorder %s4420_s19, %s3277_s26  ;;  %p3281_p2 = scmp.lt.u32.totalorder %s3277_s26, %s4420_s19 }
  0xee   :  { %p3283_p3 = pnand %p3281_p2, %p3278_p1 }
  0xf0   :  { %3286 = shalt.err (!%p3283_p3)
}
  0xf1   :  { %s3287_s29 = scalar_lea.vmem %s3937_s27, 1024  ;;  %p3292_p5 = scmp.lt.s32.totalorder %s3937_s27, %s3937_s27 }
  0xf2   :  { %p3288_p4 = scmp.ne.s32.totalorder %s3937_s27, %s3287_s29  ;;  %p3293_p6 = scmp.lt.s32.totalorder %s3287_s29, %s3287_s29 }
  0xf4   :  { %p3294_p7 = por %p3293_p6, %p3292_p5 }
  0xf6   :  { %p3295_p8 = pnand %p3294_p7, %p3288_p4 }
  0xf8   :  { %3298 = shalt.err (!%p3295_p8)
}
  0xf9   :  { %198 = dma.hbm_to_vmem [thread:$0]  %s4420_s19, 1024, %s3937_s27, [#allocation24], %s4463_s8, %s4463_s8, %s4462_s5  }
  0xfa   :  { %s3611_s30 = smov [#allocation26]   ;;  %s3299_s12 = scalar_lea.hbm %s4426_s25, 384 }
  0xfb   :  { %s212_s0 = sshll.u32 %s3611_s30, 4  ;;  %p3300_p9 = scmp.ne.s32.totalorder %s4426_s25, %s3299_s12  ;;  %s213_s0 = int_to_ptr.vmem [resolvable:$true] %s212_s0 }
  0xfc   :  { %p3303_p10 = scmp.lt.u32.totalorder %s3299_s12, %s4426_s25 }
  0xfe   :  { %p3305_p11 = pnand %p3303_p10, %p3300_p9 }
 0x100   :  { %3308 = shalt.err (!%p3305_p11)
}
 0x101   :  { %s3309_s26 = scalar_lea.vmem %s213_s0, 384  ;;  %p3314_p13 = scmp.lt.s32.totalorder %s213_s0, %s213_s0 }
 0x102   :  { %p3310_p12 = scmp.ne.s32.totalorder %s213_s0, %s3309_s26  ;;  %p3315_p0 = scmp.lt.s32.totalorder %s3309_s26, %s3309_s26 }
 0x104   :  { %p3316_p1 = por %p3315_p0, %p3314_p13 }
 0x106   :  { %p3317_p2 = pnand %p3316_p1, %p3310_p12 }
 0x108   :  { %3320 = shalt.err (!%p3317_p2)
}
 0x109   :  { %218 = dma.hbm_to_vmem [thread:$0]  %s4426_s25, 384, %s213_s0, [#allocation27], %s3597_s2, %s3597_s2, %s3598_s3  }
 0x10a   :  { %3557 = dma.done.wait [#allocation9], 16  }
 0x10b   :  { %3558 = vsyncadd [#allocation9], 4294967280 }
 0x10c   :  { %3559 = dma.done.wait [#allocation7], 2048  }
 0x10d   :  { %3560 = vsyncadd [#allocation7], 4294965248 }
 0x10e   :  { %3561 = dma.done.wait [#allocation12], 3072  }
 0x10f   :  { %3562 = vsyncadd [#allocation12], 4294964224 }
 0x110   :  { %3563 = dma.done.wait [#allocation15], 4096  }
 0x111   :  { %3564 = vsyncadd [#allocation15], 4294963200 }
 0x112   :  { %3565 = dma.done.wait [#allocation18], 2048  }
 0x113   :  { %3566 = vsyncadd [#allocation18], 4294965248 }
 0x114   :  { %3567 = dma.done.wait [#allocation21], 4096  }
 0x115   :  { %3568 = vsyncadd [#allocation21], 4294963200 }
 0x116   :  { %3569 = dma.done.wait [#allocation24], 2048  }
 0x117   :  { %3570 = vsyncadd [#allocation24], 4294965248 }
 0x118   :  { %3571 = dma.done.wait [#allocation27], 384  }
 0x119   :  { %3572 = vsyncadd [#allocation27], 4294966912 }
 0x11a   :  { %258 = sfence }
 0x11b   :  { %s260_s11 = sld [smem:[#allocation6]]  ;;  %s3612_s10 = smov [#allocation2]   ;;  %v3613_v0 = vmov 0  }
 0x11c   :  { %s277_s25 = sshll.u32 %s3612_s10, 4  ;;  %s3989_s7 = sld [smem:[#allocation6 + $0x1]]  ;;  %551 = vmatprep.mubr.bf16.mxu0 %v3613_v0  ;;  %s3992_s25 = int_to_ptr.vmem [resolvable:$true] %s277_s25 }
 0x11d   :  { %s3614_s6 = smov [#allocation2 + $0x1]   ;;  %s3994_s17 = sld [smem:[#allocation6 + $0x2]] }
 0x11e   :  { %s292_s29 = sshll.u32 %s3614_s6, 4  ;;  %s3615_s16 = smov [#allocation2 + $0x2]   ;;  %s3996_s29 = int_to_ptr.vmem [resolvable:$true] %s292_s29 }
 0x11f   :  { %s307_s30 = sshll.u32 %s3615_s16, 4  ;;  %s3998_s0 = sld [smem:[#allocation6 + $0x3]]  ;;  %s4000_s30 = int_to_ptr.vmem [resolvable:$true] %s307_s30 }
 0x120   :  { %s4467_s28 = sld [smem:[#allocation71_spill]] }
 0x121   :  { %s2446_s4 = sshll.u32 %s260_s11, 4 }
 0x122   :  { %s2447_s9 = sshll.u32 %s3989_s7, 4 }
 0x126   :  { %s269_s18 = scalar_lea.hbm %s4467_s28, %s2446_s4  ;;  %s4009_s27 = scalar_lea.hbm %s4467_s28, 16384 }
 0x127   :  { %s3321_s24 = scalar_lea.hbm %s269_s18, 16  ;;  %p3324_p4 = scmp.lt.u32.totalorder %s269_s18, %s4467_s28 }
 0x128   :  { %p3322_p3 = scmp.ne.s32.totalorder %s269_s18, %s3321_s24  ;;  %p3325_p5 = scmp.lt.u32.totalorder %s4009_s27, %s3321_s24 }
 0x129   :  { %p3327_p7 = scmp.lt.u32.totalorder %s3321_s24, %s269_s18 }
 0x12a   :  { %p3326_p6 = por %p3325_p5, %p3324_p4 }
 0x12c   :  { %p3328_p8 = por %p3327_p7, %p3326_p6 }
 0x12e   :  { %p3329_p9 = pnand %p3328_p8, %p3322_p3 }
 0x130   :  { %3332 = shalt.err (!%p3329_p9)  }
 0x131   :  { %s3333_s11 = scalar_lea.vmem %s3992_s25, 16  ;;  %s4018_s7 = scalar_lea.vmem %s3992_s25, 128 }
 0x132   :  { %p3334_p10 = scmp.ne.s32.totalorder %s3992_s25, %s3333_s11  ;;  %p3338_p11 = scmp.lt.s32.totalorder %s3992_s25, %s3992_s25 }
 0x133   :  { %p3339_p12 = scmp.lt.s32.totalorder %s4018_s7, %s3333_s11 }
 0x135   :  { %p3340_p13 = por %p3339_p12, %p3338_p11 }
 0x137   :  { %p3341_p0 = pnand %p3340_p13, %p3334_p10 }
 0x139   :  { %3344 = shalt.err (!%p3341_p0)  }
 0x13a   :  { %280 = dma.hbm_to_vmem [thread:$0]  %s269_s18, 16, %s3992_s25, [#allocation4] }
 0x13b   :  { %s282_s1 = scalar_lea.hbm %s4467_s28, %s2447_s9  ;;  %s2448_s12 = sshll.u32 %s3994_s17, 4 }
 0x13c   :  { %s3345_s24 = scalar_lea.hbm %s282_s1, 16  ;;  %p3348_p2 = scmp.lt.u32.totalorder %s282_s1, %s4467_s28 }
 0x13d   :  { %p3346_p1 = scmp.ne.s32.totalorder %s282_s1, %s3345_s24  ;;  %p3349_p3 = scmp.lt.u32.totalorder %s4009_s27, %s3345_s24 }
 0x13e   :  { %p3351_p5 = scmp.lt.u32.totalorder %s3345_s24, %s282_s1 }
 0x13f   :  { %p3350_p4 = por %p3349_p3, %p3348_p2 }
 0x141   :  { %p3352_p6 = por %p3351_p5, %p3350_p4 }
 0x143   :  { %p3353_p7 = pnand %p3352_p6, %p3346_p1 }
 0x145   :  { %3356 = shalt.err (!%p3353_p7)  }
 0x146   :  { %s3357_s18 = scalar_lea.vmem %s3996_s29, 16  ;;  %p3362_p9 = scmp.lt.s32.totalorder %s3996_s29, %s3992_s25 }
 0x147   :  { %p3358_p8 = scmp.ne.s32.totalorder %s3996_s29, %s3357_s18  ;;  %p3363_p10 = scmp.lt.s32.totalorder %s4018_s7, %s3357_s18 }
 0x149   :  { %p3364_p11 = por %p3363_p10, %p3362_p9 }
 0x14b   :  { %p3365_p12 = pnand %p3364_p11, %p3358_p8 }
 0x14d   :  { %3368 = shalt.err (!%p3365_p12)  }
 0x14e   :  { %295 = dma.hbm_to_vmem [thread:$0]  %s282_s1, 16, %s3996_s29, [#allocation4 + $0x1] }
 0x14f   :  { %s297_s10 = scalar_lea.hbm %s4467_s28, %s2448_s12  ;;  %s2449_s6 = sshll.u32 %s3998_s0, 4 }
 0x150   :  { %s3369_s11 = scalar_lea.hbm %s297_s10, 16  ;;  %p3372_p0 = scmp.lt.u32.totalorder %s297_s10, %s4467_s28 }
 0x151   :  { %p3370_p13 = scmp.ne.s32.totalorder %s297_s10, %s3369_s11  ;;  %p3373_p1 = scmp.lt.u32.totalorder %s4009_s27, %s3369_s11 }
 0x152   :  { %p3375_p3 = scmp.lt.u32.totalorder %s3369_s11, %s297_s10 }
 0x153   :  { %p3374_p2 = por %p3373_p1, %p3372_p0 }
 0x155   :  { %p3376_p4 = por %p3375_p3, %p3374_p2 }
 0x157   :  { %p3377_p5 = pnand %p3376_p4, %p3370_p13 }
 0x159   :  { %3380 = shalt.err (!%p3377_p5)  }
 0x15a   :  { %s3381_s29 = scalar_lea.vmem %s4000_s30, 16  ;;  %p3386_p7 = scmp.lt.s32.totalorder %s4000_s30, %s3992_s25 }
 0x15b   :  { %p3382_p6 = scmp.ne.s32.totalorder %s4000_s30, %s3381_s29  ;;  %p3387_p8 = scmp.lt.s32.totalorder %s4018_s7, %s3381_s29 }
 0x15d   :  { %p3388_p9 = por %p3387_p8, %p3386_p7 }
 0x15f   :  { %p3389_p10 = pnand %p3388_p9, %p3382_p6 }
 0x161   :  { %3392 = shalt.err (!%p3389_p10)  }
 0x162   :  { %310 = dma.hbm_to_vmem [thread:$0]  %s297_s10, 16, %s4000_s30, [#allocation4 + $0x2] }
 0x163   :  { %s312_s12 = scalar_lea.hbm %s4467_s28, %s2449_s6  ;;  %s3616_s24 = smov [#allocation2 + $0x3]  }
 0x164   :  { %s322_s26 = sshll.u32 %s3616_s24, 4  ;;  %s4055_s19 = sld [smem:[#allocation6 + $0x4]]  ;;  %s323_s26 = int_to_ptr.vmem [resolvable:$true] %s322_s26 }
 0x165   :  { %s3393_s18 = scalar_lea.hbm %s312_s12, 16  ;;  %p3396_p12 = scmp.lt.u32.totalorder %s312_s12, %s4467_s28 }
 0x166   :  { %p3394_p11 = scmp.ne.s32.totalorder %s312_s12, %s3393_s18  ;;  %p3397_p13 = scmp.lt.u32.totalorder %s4009_s27, %s3393_s18 }
 0x167   :  { %p3399_p1 = scmp.lt.u32.totalorder %s3393_s18, %s312_s12 }
 0x168   :  { %p3398_p0 = por %p3397_p13, %p3396_p12 }
 0x16a   :  { %p3400_p2 = por %p3399_p1, %p3398_p0 }
 0x16c   :  { %p3401_p3 = pnand %p3400_p2, %p3394_p11 }
 0x16e   :  { %3404 = shalt.err (!%p3401_p3)  }
 0x16f   :  { %s3405_s30 = scalar_lea.vmem %s323_s26, 16  ;;  %p3410_p5 = scmp.lt.s32.totalorder %s323_s26, %s3992_s25 }
 0x170   :  { %p3406_p4 = scmp.ne.s32.totalorder %s323_s26, %s3405_s30  ;;  %p3411_p6 = scmp.lt.s32.totalorder %s4018_s7, %s3405_s30 }
 0x172   :  { %p3412_p7 = por %p3411_p6, %p3410_p5 }
 0x174   :  { %p3413_p8 = pnand %p3412_p7, %p3406_p4 }
 0x176   :  { %3416 = shalt.err (!%p3413_p8)  }
 0x177   :  { %325 = dma.hbm_to_vmem [thread:$0]  %s312_s12, 16, %s323_s26, [#allocation4 + $0x3] }
 0x178   :  { %s3617_s10 = smov [#allocation2 + $0x4]   ;;  %s4063_s11 = sld [smem:[#allocation6 + $0x5]] }
 0x179   :  { %s337_s6 = sshll.u32 %s3617_s10, 4  ;;  %s3618_s16 = smov [#allocation2 + $0x5]   ;;  %s338_s6 = int_to_ptr.vmem [resolvable:$true] %s337_s6 }
 0x17a   :  { %s352_s4 = sshll.u32 %s3618_s16, 4  ;;  %s4065_s29 = sld [smem:[#allocation6 + $0x6]]  ;;  %s4068_s4 = int_to_ptr.vmem [resolvable:$true] %s352_s4 }
 0x17b   :  { %s2450_s0 = sshll.u32 %s4055_s19, 4 }
 0x17c   :  { %s327_s18 = scalar_lea.hbm %s4467_s28, %s2450_s0 }
 0x17d   :  { %s3417_s17 = scalar_lea.hbm %s327_s18, 16  ;;  %p3420_p10 = scmp.lt.u32.totalorder %s327_s18, %s4467_s28 }
 0x17e   :  { %p3418_p9 = scmp.ne.s32.totalorder %s327_s18, %s3417_s17  ;;  %p3421_p11 = scmp.lt.u32.totalorder %s4009_s27, %s3417_s17 }
 0x17f   :  { %p3423_p13 = scmp.lt.u32.totalorder %s3417_s17, %s327_s18 }
 0x180   :  { %p3422_p12 = por %p3421_p11, %p3420_p10 }
 0x182   :  { %p3424_p0 = por %p3423_p13, %p3422_p12 }
 0x184   :  { %p3425_p1 = pnand %p3424_p0, %p3418_p9 }
 0x186   :  { %3428 = shalt.err (!%p3425_p1)  }
 0x187   :  { %s3429_s9 = scalar_lea.vmem %s338_s6, 16  ;;  %p3434_p3 = scmp.lt.s32.totalorder %s338_s6, %s3992_s25 }
 0x188   :  { %p3430_p2 = scmp.ne.s32.totalorder %s338_s6, %s3429_s9  ;;  %p3435_p4 = scmp.lt.s32.totalorder %s4018_s7, %s3429_s9 }
 0x18a   :  { %p3436_p5 = por %p3435_p4, %p3434_p3 }
 0x18c   :  { %p3437_p6 = pnand %p3436_p5, %p3430_p2 }
 0x18e   :  { %3440 = shalt.err (!%p3437_p6)  }
 0x18f   :  { %340 = dma.hbm_to_vmem [thread:$0]  %s327_s18, 16, %s338_s6, [#allocation4 + $0x4] }
 0x190   :  { %s2451_s19 = sshll.u32 %s4063_s11, 4  ;;  %s3619_s30 = smov [#allocation2 + $0x6]  }
 0x191   :  { %s367_s10 = sshll.u32 %s3619_s30, 4  ;;  %s342_s1 = scalar_lea.hbm %s4467_s28, %s2451_s19  ;;  %s4083_s10 = int_to_ptr.vmem [resolvable:$true] %s367_s10 }
 0x192   :  { %s3441_s24 = scalar_lea.hbm %s342_s1, 16  ;;  %p3444_p8 = scmp.lt.u32.totalorder %s342_s1, %s4467_s28 }
 0x193   :  { %p3442_p7 = scmp.ne.s32.totalorder %s342_s1, %s3441_s24  ;;  %p3445_p9 = scmp.lt.u32.totalorder %s4009_s27, %s3441_s24 }
 0x194   :  { %p3447_p11 = scmp.lt.u32.totalorder %s3441_s24, %s342_s1 }
 0x195   :  { %p3446_p10 = por %p3445_p9, %p3444_p8 }
 0x197   :  { %p3448_p12 = por %p3447_p11, %p3446_p10 }
 0x199   :  { %p3449_p13 = pnand %p3448_p12, %p3442_p7 }
 0x19b   :  { %3452 = shalt.err (!%p3449_p13)  }
 0x19c   :  { %s3453_s6 = scalar_lea.vmem %s4068_s4, 16  ;;  %p3458_p1 = scmp.lt.s32.totalorder %s4068_s4, %s3992_s25 }
 0x19d   :  { %p3454_p0 = scmp.ne.s32.totalorder %s4068_s4, %s3453_s6  ;;  %p3459_p2 = scmp.lt.s32.totalorder %s4018_s7, %s3453_s6 }
 0x19f   :  { %p3460_p3 = por %p3459_p2, %p3458_p1 }
 0x1a1   :  { %p3461_p4 = pnand %p3460_p3, %p3454_p0 }
 0x1a3   :  { %3464 = shalt.err (!%p3461_p4)  }
 0x1a4   :  { %355 = dma.hbm_to_vmem [thread:$0]  %s342_s1, 16, %s4068_s4, [#allocation4 + $0x5] }
 0x1a5   :  { %s2452_s11 = sshll.u32 %s4065_s29, 4  ;;  %s2445_s18 = sld [smem:[#allocation6 + $0x7]] }
 0x1a6   :  { %s357_s19 = scalar_lea.hbm %s4467_s28, %s2452_s11 }
 0x1a7   :  { %s3465_s30 = scalar_lea.hbm %s357_s19, 16  ;;  %p3468_p6 = scmp.lt.u32.totalorder %s357_s19, %s4467_s28 }
 0x1a8   :  { %p3466_p5 = scmp.ne.s32.totalorder %s357_s19, %s3465_s30  ;;  %p3469_p7 = scmp.lt.u32.totalorder %s4009_s27, %s3465_s30 }
 0x1a9   :  { %p3471_p9 = scmp.lt.u32.totalorder %s3465_s30, %s357_s19 }
 0x1aa   :  { %p3470_p8 = por %p3469_p7, %p3468_p6 }
 0x1ac   :  { %p3472_p10 = por %p3471_p9, %p3470_p8 }
 0x1ae   :  { %p3473_p11 = pnand %p3472_p10, %p3466_p5 }
 0x1b0   :  { %3476 = shalt.err (!%p3473_p11)  }
 0x1b1   :  { %s3477_s4 = scalar_lea.vmem %s4083_s10, 16  ;;  %p3482_p13 = scmp.lt.s32.totalorder %s4083_s10, %s3992_s25 }
 0x1b2   :  { %p3478_p12 = scmp.ne.s32.totalorder %s4083_s10, %s3477_s4  ;;  %p3483_p0 = scmp.lt.s32.totalorder %s4018_s7, %s3477_s4 }
 0x1b4   :  { %p3484_p1 = por %p3483_p0, %p3482_p13 }
 0x1b6   :  { %p3485_p2 = pnand %p3484_p1, %p3478_p12 }
 0x1b8   :  { %3488 = shalt.err (!%p3485_p2)  }
 0x1b9   :  { %370 = dma.hbm_to_vmem [thread:$0]  %s357_s19, 16, %s4083_s10, [#allocation4 + $0x6] }
 0x1ba   :  { %s3620_s29 = smov [#allocation2 + $0x7]   ;;  %s390_s24 = sld [smem:[#allocation0]]  }
 0x1bb   :  { %s382_s1 = sshll.u32 %s3620_s29, 4  ;;  %s3621_s17 = smov [#allocation3]   ;;  %s383_s1 = int_to_ptr.vmem [resolvable:$true] %s382_s1 }
 0x1bc   :  { %s4109_s12 = sshll.u32 %s3621_s17, 4  ;;  %s2453_s6 = sshll.u32 %s2445_s18, 4  ;;  %s399_s12 = int_to_ptr.vmem [resolvable:$true] %s4109_s12 }
 0x1bd   :  { %s372_s9 = scalar_lea.hbm %s4467_s28, %s2453_s6  ;;  %s3622_s30 = smov 1024  }
 0x1be   :  { %402 = sst [smem:[#allocation50]] %s3622_s30  ;;  %s3489_s16 = scalar_lea.hbm %s372_s9, 16 }
 0x1bf   :  { %p3490_p3 = scmp.ne.s32.totalorder %s372_s9, %s3489_s16  ;;  %p3492_p4 = scmp.lt.u32.totalorder %s372_s9, %s4467_s28 }
 0x1c0   :  { %p3493_p5 = scmp.lt.u32.totalorder %s4009_s27, %s3489_s16  ;;  %p3495_p7 = scmp.lt.u32.totalorder %s3489_s16, %s372_s9 }
 0x1c2   :  { %p3494_p6 = por %p3493_p5, %p3492_p4 }
 0x1c4   :  { %p3496_p8 = por %p3495_p7, %p3494_p6 }
 0x1c6   :  { %p3497_p9 = pnand %p3496_p8, %p3490_p3 }
 0x1c8   :  { %3500 = shalt.err (!%p3497_p9)  }
 0x1c9   :  { %s3501_s18 = scalar_lea.vmem %s383_s1, 16  ;;  %p3506_p11 = scmp.lt.s32.totalorder %s383_s1, %s3992_s25 }
 0x1ca   :  { %p3502_p10 = scmp.ne.s32.totalorder %s383_s1, %s3501_s18  ;;  %p3507_p12 = scmp.lt.s32.totalorder %s4018_s7, %s3501_s18 }
 0x1cc   :  { %p3508_p13 = por %p3507_p12, %p3506_p11 }
 0x1ce   :  { %p3509_p0 = pnand %p3508_p13, %p3502_p10 }
 0x1d0   :  { %3512 = shalt.err (!%p3509_p0)  }
 0x1d1   :  { %385 = dma.hbm_to_vmem [thread:$0]  %s372_s9, 16, %s383_s1, [#allocation4 + $0x7] }
 0x1d2   :  { %s2454_s19 = sshll.u32 %s390_s24, 26  ;;  %404 = sst [smem:[#allocation50 + $0x1]] %s3622_s30 }
 0x1d3   :  { %s2455_s28 = sadd.s32 134217728, %s2454_s19  ;;  %406 = sst [smem:[#allocation50 + $0x2]] %s3598_s3 }
 0x1d4   :  { %408 = sst [smem:[#allocation50 + $0x3]] %s4463_s8  ;;  %s3623_s27 = smov 2  }
 0x1d5   :  { %410 = sst [smem:[#allocation50 + $0x4]] %s3597_s2  ;;  %s3624_s4 = smov 512  }
 0x1d6   :  { %412 = sst [smem:[#allocation50 + $0x5]] %s3623_s27  ;;  %s3625_s25 = smov [#allocation5]  }
 0x1d7   :  { %414 = sst [smem:[#allocation50 + $0x6]] %s3624_s4  ;;  %s3626_s7 = smov [#allocation49]  }
 0x1d8   :  { %416 = sst [smem:[#allocation50 + $0x7]] %s4463_s8 }
 0x1d9   :  { %418 = sst [smem:[#allocation50 + $0x8]] %s4462_s5 }
 0x1da   :  { %420 = dma.general %s4424_s23, 8192, %s399_s12, %s3625_s25, %s3626_s7, [#allocation50], %s2455_s28, 0  }
 0x1db   :  { %v4131_v1 = vld [vmem:[#allocation13] sm:$0xf]  ;;  %v4133_v2 = vld [vmem:[#allocation13 + $0x4] sm:$0xf]  ;;  %v4135_v3 = vld [vmem:[#allocation13 + $0x8] sm:$0xf] }
 0x1dc   :  { %v4137_v4 = vld [vmem:[#allocation13 + $0xc] sm:$0xf]  ;;  %v4139_v5 = vld [vmem:[#allocation13 + $0x10] sm:$0xf]  ;;  %v4141_v6 = vld [vmem:[#allocation13 + $0x14] sm:$0xf] }
 0x1dd   :  { %v4143_v7 = vld [vmem:[#allocation13 + $0x18] sm:$0xf]  ;;  %v4145_v8 = vld [vmem:[#allocation13 + $0x1c] sm:$0xf]  ;;  %v4147_v9 = vld [vmem:[#allocation13 + $0x20] sm:$0xf] }
 0x1de   :  { %v4149_v10 = vld [vmem:[#allocation13 + $0x24] sm:$0xf]  ;;  %v4151_v11 = vld [vmem:[#allocation13 + $0x28] sm:$0xf]  ;;  %v4153_v12 = vld [vmem:[#allocation13 + $0x2c] sm:$0xf] }
 0x1df   :  { %v4155_v13 = vld [vmem:[#allocation13 + $0x30] sm:$0xf]  ;;  %v4157_v14 = vld [vmem:[#allocation13 + $0x34] sm:$0xf]  ;;  %v4159_v15 = vld [vmem:[#allocation13 + $0x38] sm:$0xf] }
 0x1e0   :  { %v4161_v16 = vld [vmem:[#allocation13 + $0x3c] sm:$0xf]  ;;  %v2831_v17 = vld [vmem:[#allocation11 + $0x4] ss:$8 sps:$4 sm:$0xff]   ;;  %v2833_v18 = vld [vmem:[#allocation11] ss:$8 sps:$4 sm:$0xff]  }
 0x1e1   :  { %v2834_v19 = vld [vmem:[#allocation11 + $0x14] ss:$8 sps:$4 sm:$0xff]   ;;  %519 = vmatprep.subr.bf16.mxu0 %v2831_v17  ;;  %v2836_v20 = vld [vmem:[#allocation11 + $0x10] ss:$8 sps:$4 sm:$0xff]   ;;  %v2837_v21 = vld [vmem:[#allocation11 + $0x24] ss:$8 sps:$4 sm:$0xff]  }
 0x1e2   :  { %520 = vmatpush1.bf16.msra.mxu0 %v2833_v18  ;;  %v2839_v22 = vld [vmem:[#allocation11 + $0x20] ss:$8 sps:$4 sm:$0xff]   ;;  %v2840_v23 = vld [vmem:[#allocation11 + $0x34] ss:$8 sps:$4 sm:$0xff]   ;;  %v2842_v24 = vld [vmem:[#allocation11 + $0x30] ss:$8 sps:$4 sm:$0xff]  }
 0x1e3   :  { %521 = vmatprep.subr.bf16.mxu0 %v2834_v19  ;;  %v2843_v25 = vld [vmem:[#allocation11 + $0x44] ss:$8 sps:$4 sm:$0xff]   ;;  %v2845_v26 = vld [vmem:[#allocation11 + $0x40] ss:$8 sps:$4 sm:$0xff]   ;;  %v2846_v27 = vld [vmem:[#allocation11 + $0x54] ss:$8 sps:$4 sm:$0xff]  }
 0x1e4   :  { %v2848_v28 = vld [vmem:[#allocation11 + $0x50] ss:$8 sps:$4 sm:$0xff]   ;;  %v2849_v29 = vld [vmem:[#allocation11 + $0x64] ss:$8 sps:$4 sm:$0xff]   ;;  %v2851_v30 = vld [vmem:[#allocation11 + $0x60] ss:$8 sps:$4 sm:$0xff]  }
 0x1e5   :  { %v2852_v31 = vld [vmem:[#allocation11 + $0x74] ss:$8 sps:$4 sm:$0xff]   ;;  %v2854_v32 = vld [vmem:[#allocation11 + $0x70] ss:$8 sps:$4 sm:$0xff]   ;;  %v4163_v33 = vld [vmem:[#allocation26] sm:$0xff] }
 0x1e6   :  { %522 = vmatpush1.bf16.msra.mxu0 %v2836_v20  ;;  %v4167_v34 = vpack.c.bf16 %v4163_v33, %v4163_v33 }
 0x1e7   :  { %523 = vmatprep.subr.bf16.mxu0 %v2837_v21 }
 0x1ea   :  { %524 = vmatpush1.bf16.msra.mxu0 %v2839_v22 }
 0x1eb   :  { %525 = vmatprep.subr.bf16.mxu0 %v2840_v23 }
 0x1ee   :  { %526 = vmatpush1.bf16.msra.mxu0 %v2842_v24 }
 0x1ef   :  { %527 = vmatprep.subr.bf16.mxu0 %v2843_v25 }
 0x1f2   :  { %528 = vmatpush1.bf16.msra.mxu0 %v2845_v26 }
 0x1f3   :  { %529 = vmatprep.subr.bf16.mxu0 %v2846_v27 }
 0x1f6   :  { %530 = vmatpush1.bf16.msra.mxu0 %v2848_v28 }
 0x1f7   :  { %531 = vmatprep.subr.bf16.mxu0 %v2849_v29 }
 0x1fa   :  { %532 = vmatpush1.bf16.msra.mxu0 %v2851_v30 }
 0x1fb   :  { %533 = vmatprep.subr.bf16.mxu0 %v2852_v31 }
 0x1fe   :  { %534 = vmatpush1.bf16.msra.mxu0 %v2854_v32 }
 0x201   :  { %552 = vmatmul.mubr.bf16.vlgmr.msra.gmra.mrb[0].mxu0 %v4167_v34 }
 0x2d4   :  { %v4170_v35 = vpop.f32.mrb[0].mxu0 }
 0x2d5   :  { %v4172_v36 = vpop.f32.mrb[1].mxu0 }
 0x2d6   :  { %v557_v37 = vpop.f32.mrb[2].mxu0 }
 0x2d7   :  { %v558_v38 = vpop.f32.mrb[3].mxu0 }
 0x2d8   :  { %3573 = dma.done.wait [#allocation4], 16 }
 0x2d9   :  { %3574 = vsyncadd [#allocation4], 4294967280 }
 0x2da   :  { %3575 = dma.done.wait [#allocation4 + $0x1], 16 }
 0x2db   :  { %3576 = vsyncadd [#allocation4 + $0x1], 4294967280 }
 0x2dc   :  { %3577 = dma.done.wait [#allocation4 + $0x2], 16 }
 0x2dd   :  { %3578 = vsyncadd [#allocation4 + $0x2], 4294967280 }
 0x2de   :  { %3579 = dma.done.wait [#allocation4 + $0x3], 16 }
 0x2df   :  { %3580 = vsyncadd [#allocation4 + $0x3], 4294967280 }
 0x2e0   :  { %3581 = dma.done.wait [#allocation4 + $0x4], 16 }
 0x2e1   :  { %3582 = vsyncadd [#allocation4 + $0x4], 4294967280 }
 0x2e2   :  { %3583 = dma.done.wait [#allocation4 + $0x5], 16 }
 0x2e3   :  { %3584 = vsyncadd [#allocation4 + $0x5], 4294967280 }
 0x2e4   :  { %3585 = dma.done.wait [#allocation4 + $0x6], 16 }
 0x2e5   :  { %3586 = vsyncadd [#allocation4 + $0x6], 4294967280 }
 0x2e6   :  { %3587 = dma.done.wait [#allocation4 + $0x7], 16 }
 0x2e7   :  { %3588 = vsyncadd [#allocation4 + $0x7], 4294967280  ;;  %722 = vmatprep.mubr.bf16.mxu1 %v3613_v0  ;;  %v3627_v39 = vmov 0.0   ;;  %vm3628_vm0 = vmmov 0   ;;  %v2855_v40 = vld [vmem:[#allocation10 + $0x4] ss:$8 sps:$4 sm:$0xff]   ;;  %v2500_v17 = vcombine.low %v4131_v1, %v4133_v2  ;;  %v2501_v19 = vcombine.low %v4135_v3, %v4137_v4 }
 0x2e8   :  { %2675 = vmatprep.subr.bf16.mxu0 %v3627_v39  ;;  %2691 = vmatprep.mubr.msk.bf16.mxu0 %vm3628_vm0, %v3627_v39  ;;  %v2857_v41 = vld [vmem:[#allocation10] ss:$8 sps:$4 sm:$0xff]   ;;  %v2858_v42 = vld [vmem:[#allocation10 + $0x14] ss:$8 sps:$4 sm:$0xff]   ;;  %v2860_v43 = vld [vmem:[#allocation10 + $0x10] ss:$8 sps:$4 sm:$0xff]   ;;  %v2502_v2 = vcombine.low %v4139_v5, %v4141_v6  ;;  %v2503_v4 = vcombine.low %v4143_v7, %v4145_v8  ;;  %v2504_v5 = vcombine.low %v4147_v9, %v4149_v10 }
 0x2e9   :  { %690 = vmatprep.subr.bf16.mxu1 %v2855_v40  ;;  %v2861_v44 = vld [vmem:[#allocation10 + $0x24] ss:$8 sps:$4 sm:$0xff]   ;;  %v2863_v45 = vld [vmem:[#allocation10 + $0x20] ss:$8 sps:$4 sm:$0xff]   ;;  %v2864_v46 = vld [vmem:[#allocation10 + $0x34] ss:$8 sps:$4 sm:$0xff]   ;;  %v2505_v6 = vcombine.low %v4151_v11, %v4153_v12  ;;  %v2506_v7 = vcombine.low %v4155_v13, %v4157_v14  ;;  %v2507_v8 = vcombine.low %v4159_v15, %v4161_v16 }
 0x2ea   :  { %691 = vmatpush1.bf16.msra.mxu1 %v2857_v41  ;;  %v2866_v47 = vld [vmem:[#allocation10 + $0x30] ss:$8 sps:$4 sm:$0xff]   ;;  %s4468_s8 = sld [smem:[#allocation74_spill]]  ;;  %v2867_v49 = vld [vmem:[#allocation10 + $0x44] ss:$8 sps:$4 sm:$0xff]   ;;  %s4469_s25 = sld [smem:[#allocation76_spill]] }
 0x2eb   :  { %692 = vmatprep.subr.bf16.mxu1 %v2858_v42  ;;  %v2869_v51 = vld [vmem:[#allocation10 + $0x40] ss:$8 sps:$4 sm:$0xff]   ;;  %v2870_v52 = vld [vmem:[#allocation10 + $0x54] ss:$8 sps:$4 sm:$0xff]   ;;  %v2872_v54 = vld [vmem:[#allocation10 + $0x50] ss:$8 sps:$4 sm:$0xff]  }
 0x2ec   :  { %v2873_v55 = vld [vmem:[#allocation10 + $0x64] ss:$8 sps:$4 sm:$0xff]   ;;  %v2875_v56 = vld [vmem:[#allocation10 + $0x60] ss:$8 sps:$4 sm:$0xff]   ;;  %v2876_v58 = vld [vmem:[#allocation10 + $0x74] ss:$8 sps:$4 sm:$0xff]  }
 0x2ed   :  { %v2878_v60 = vld [vmem:[#allocation10 + $0x70] ss:$8 sps:$4 sm:$0xff]   ;;  %v2889_v1 = vld [vmem:[#allocation16 + $0x4] ss:$8 sps:$4 sm:$0xff]   ;;  %v2887_v21 = vld [vmem:[#allocation16] ss:$8 sps:$4 sm:$0xff]  }
 0x2ee   :  { %693 = vmatpush1.bf16.msra.mxu1 %v2860_v43  ;;  %v592_v61 = vld [vmem:[#allocation2] sm:$0xff]  ;;  %v2895_v9 = vld [vmem:[#allocation16 + $0x24] ss:$8 sps:$4 sm:$0xff]   ;;  %v2893_v10 = vld [vmem:[#allocation16 + $0x20] ss:$8 sps:$4 sm:$0xff]   ;;  %s4470_s1 = sld [smem:[#allocation77_spill]] }
 0x2ef   :  { %694 = vmatprep.subr.bf16.mxu1 %v2861_v44  ;;  %v593_v63 = vpack.c.bf16 %v592_v61, %v592_v61  ;;  %v2892_v3 = vld [vmem:[#allocation16 + $0x14] ss:$8 sps:$4 sm:$0xff]   ;;  %v2890_v22 = vld [vmem:[#allocation16 + $0x10] ss:$8 sps:$4 sm:$0xff]   ;;  %v2901_v13 = vld [vmem:[#allocation16 + $0x44] ss:$8 sps:$4 sm:$0xff]  }
 0x2f0   :  { %v2879_v48 = vld [vmem:[%s4468_s8] sm:$0xff]   ;;  %v2880_v50 = vld [vmem:[%s4468_s8 + $0x8] sm:$0xff]   ;;  %v2881_v53 = vld [vmem:[%s4468_s8 + $0x10] sm:$0xff]  }
 0x2f1   :  { %2676 = vmatpush3.bf16.msra.mxu0 %v2879_v48  ;;  %v2882_v57 = vld [vmem:[%s4468_s8 + $0x18] sm:$0xff]   ;;  %v2883_v59 = vld [vmem:[%s4468_s8 + $0x20] sm:$0xff]   ;;  %v2884_v62 = vld [vmem:[%s4468_s8 + $0x28] sm:$0xff]  }
 0x2f2   :  { %695 = vmatpush1.bf16.msra.mxu1 %v2863_v45  ;;  %2677 = vmatprep.subr.bf16.mxu0 %v3627_v39  ;;  %v2885_v18 = vld [vmem:[%s4468_s8 + $0x30] sm:$0xff]   ;;  %v2886_v20 = vld [vmem:[%s4468_s8 + $0x38] sm:$0xff]   ;;  %v2914_v31 = vld [vmem:[#allocation17] sm:$0xff]   ;;  %s4471_s8 = sld [smem:[#allocation78_spill]] }
 0x2f3   :  { %696 = vmatprep.subr.bf16.mxu1 %v2864_v46  ;;  %v2898_v11 = vld [vmem:[#allocation16 + $0x34] ss:$8 sps:$4 sm:$0xff]   ;;  %v2896_v12 = vld [vmem:[#allocation16 + $0x30] ss:$8 sps:$4 sm:$0xff]   ;;  %v2899_v14 = vld [vmem:[#allocation16 + $0x40] ss:$8 sps:$4 sm:$0xff]  }
 0x2f4   :  { %v2904_v15 = vld [vmem:[#allocation16 + $0x54] ss:$8 sps:$4 sm:$0xff]   ;;  %v2902_v16 = vld [vmem:[#allocation16 + $0x50] ss:$8 sps:$4 sm:$0xff]   ;;  %v2907_v23 = vld [vmem:[#allocation16 + $0x64] ss:$8 sps:$4 sm:$0xff]  }
 0x2f5   :  { %2678 = vmatpush3.bf16.msra.mxu0 %v2880_v50  ;;  %v2905_v24 = vld [vmem:[#allocation16 + $0x60] ss:$8 sps:$4 sm:$0xff]   ;;  %v2910_v25 = vld [vmem:[#allocation16 + $0x74] ss:$8 sps:$4 sm:$0xff]   ;;  %v2908_v26 = vld [vmem:[#allocation16 + $0x70] ss:$8 sps:$4 sm:$0xff]  }
 0x2f6   :  { %697 = vmatpush1.bf16.msra.mxu1 %v2866_v47  ;;  %2679 = vmatprep.subr.bf16.mxu0 %v3627_v39  ;;  %v2911_v27 = vld [vmem:[#allocation14] ss:$8 sps:$4 sm:$0xff]   ;;  %v2913_v28 = vld [vmem:[#allocation14 + $0x4] ss:$8 sps:$4 sm:$0xff]   ;;  %v2917_v32 = vld [vmem:[#allocation14 + $0x14] ss:$8 sps:$4 sm:$0xff]  }
 0x2f7   :  { %698 = vmatprep.subr.bf16.mxu1 %v2867_v49  ;;  %v4238_v29 = vld [vmem:[#allocation26 + $0x8] sm:$0xff]  ;;  %v2922_v41 = vld [vmem:[#allocation17 + $0x10] sm:$0xff]   ;;  %v2926_v44 = vld [vmem:[#allocation17 + $0x18] sm:$0xff]  }
 0x2f8   :  { %v4243_v30 = vpack.c.bf16 %v4238_v29, %v4238_v29  ;;  %v2918_v37 = vld [vmem:[#allocation17 + $0x8] sm:$0xff]   ;;  %v2925_v42 = vld [vmem:[#allocation14 + $0x34] ss:$8 sps:$4 sm:$0xff]   ;;  %v2923_v43 = vld [vmem:[#allocation14 + $0x30] ss:$8 sps:$4 sm:$0xff]  }
 0x2f9   :  { %2680 = vmatpush3.bf16.msra.mxu0 %v2881_v53  ;;  %v2921_v38 = vld [vmem:[#allocation14 + $0x24] ss:$8 sps:$4 sm:$0xff]   ;;  %v2919_v40 = vld [vmem:[#allocation14 + $0x20] ss:$8 sps:$4 sm:$0xff]   ;;  %v2933_v48 = vld [vmem:[#allocation14 + $0x54] ss:$8 sps:$4 sm:$0xff]  }
 0x2fa   :  { %699 = vmatpush1.bf16.msra.mxu1 %v2869_v51  ;;  %2681 = vmatprep.subr.bf16.mxu0 %v3627_v39  ;;  %v2929_v45 = vld [vmem:[#allocation14 + $0x44] ss:$8 sps:$4 sm:$0xff]   ;;  %v2927_v46 = vld [vmem:[#allocation14 + $0x40] ss:$8 sps:$4 sm:$0xff]   ;;  %v2931_v49 = vld [vmem:[#allocation14 + $0x50] ss:$8 sps:$4 sm:$0xff]  }
 0x2fb   :  { %700 = vmatprep.subr.bf16.mxu1 %v2870_v52  ;;  %v2930_v47 = vld [vmem:[#allocation17 + $0x20] sm:$0xff]   ;;  %v2934_v50 = vld [vmem:[#allocation17 + $0x28] sm:$0xff]   ;;  %v2938_v53 = vld [vmem:[#allocation17 + $0x30] sm:$0xff]  }
 0x2fc   :  { %v2937_v51 = vld [vmem:[#allocation14 + $0x64] ss:$8 sps:$4 sm:$0xff]   ;;  %v2935_v52 = vld [vmem:[#allocation14 + $0x60] ss:$8 sps:$4 sm:$0xff]   ;;  %v731_v61 = vld [vmem:[%s4469_s25] sm:$0x3] }
 0x2fd   :  { %2682 = vmatpush3.bf16.msra.mxu0 %v2882_v57  ;;  %v2953_v57 = vld [vmem:[#allocation22 + $0x4] ss:$8 sps:$4 sm:$0xff]  }
 0x2fe   :  { %701 = vmatpush1.bf16.msra.mxu1 %v2872_v54  ;;  %2683 = vmatprep.subr.bf16.mxu0 %v3627_v39  ;;  %v2941_v54 = vld [vmem:[#allocation14 + $0x74] ss:$8 sps:$4 sm:$0xff]  }
 0x2ff   :  { %702 = vmatprep.subr.bf16.mxu1 %v2873_v55  ;;  %v2939_v55 = vld [vmem:[#allocation14 + $0x70] ss:$8 sps:$4 sm:$0xff]  }
 0x301   :  { %2684 = vmatpush3.bf16.msra.mxu0 %v2883_v59 }
 0x302   :  { %703 = vmatpush1.bf16.msra.mxu1 %v2875_v56  ;;  %2685 = vmatprep.subr.bf16.mxu0 %v3627_v39  ;;  %v2942_v56 = vld [vmem:[#allocation17 + $0x38] sm:$0xff]  }
 0x303   :  { %704 = vmatprep.subr.bf16.mxu1 %v2876_v58  ;;  %v733_v58 = vlaneseq }
 0x305   :  { %2686 = vmatpush3.bf16.msra.mxu0 %v2884_v62  ;;  %v4256_v59 = vshrl.u32 %v733_v58, 7  ;;  %v2962_v58 = vld [vmem:[#allocation22 + $0x34] ss:$8 sps:$4 sm:$0xff]  }
 0x306   :  { %705 = vmatpush1.bf16.msra.mxu1 %v2878_v60  ;;  %2687 = vmatprep.subr.bf16.mxu0 %v3627_v39 }
 0x307   :  { %2695 = vmatprep.subr.bf16.mxu1 %v3627_v39  ;;  %v4259_v60 = vsub.s32 0, %v4256_v59 }
 0x309   :  { %723 = vmatmul.mubr.bf16.vlgmr.msra.gmra.mrb[0].mxu1 %v593_v63  ;;  %2688 = vmatpush3.bf16.msra.mxu0 %v2885_v18  ;;  %v736_v62 = vrot.slane %v731_v61, %v4259_v60 }
 0x30a   :  { %2696 = vmatpush3.bf16.msra.mxu1 %v2500_v17  ;;  %2711 = vmatprep.mubr.msk.bf16.mxu1 %vm3628_vm0, %v3627_v39 }
 0x30b   :  { %2697 = vmatprep.subr.bf16.mxu1 %v3627_v39  ;;  %2689 = vmatprep.subr.bf16.mxu0 %v3627_v39 }
 0x30d   :  { %2690 = vmatpush3.bf16.msra.mxu0 %v2886_v20 }
 0x30e   :  { %2698 = vmatpush3.bf16.msra.mxu1 %v2501_v19  ;;  %1071 = vmatprep.subr.bf16.mxu0 %v2889_v1  ;;  %v4267_v19 = vsub.s32 1, %v4256_v59 }
 0x30f   :  { %2699 = vmatprep.subr.bf16.mxu1 %v3627_v39 }
 0x310   :  { %2692 = vmatmul.mubr.bf16.vlgmr.msra.gmra.mrb[4].mxu0 %v593_v63 }
 0x311   :  { %1072 = vmatpush1.bf16.msra.mxu0 %v2887_v21  ;;  %1103 = vmatprep.mubr.bf16.mxu0 %v3613_v0 }
 0x312   :  { %2700 = vmatpush3.bf16.msra.mxu1 %v2502_v2  ;;  %1073 = vmatprep.subr.bf16.mxu0 %v2892_v3 }
 0x313   :  { %2701 = vmatprep.subr.bf16.mxu1 %v3627_v39 }
 0x315   :  { %1074 = vmatpush1.bf16.msra.mxu0 %v2890_v22 }
 0x316   :  { %2702 = vmatpush3.bf16.msra.mxu1 %v2503_v4  ;;  %1075 = vmatprep.subr.bf16.mxu0 %v2895_v9  ;;  %v740_v4 = vrot.slane %v731_v61, %v4267_v19  ;;  %v2960_v61 = vld [vmem:[#allocation22 + $0x30] ss:$8 sps:$4 sm:$0xff]  }
 0x317   :  { %2703 = vmatprep.subr.bf16.mxu1 %v3627_v39 }
 0x319   :  { %1076 = vmatpush1.bf16.msra.mxu0 %v2893_v10 }
 0x31a   :  { %2704 = vmatpush3.bf16.msra.mxu1 %v2504_v5  ;;  %1077 = vmatprep.subr.bf16.mxu0 %v2898_v11 }
 0x31b   :  { %2705 = vmatprep.subr.bf16.mxu1 %v3627_v39 }
 0x31d   :  { %1078 = vmatpush1.bf16.msra.mxu0 %v2896_v12  ;;  %v2490_v12 = vld [vmem:[%s4470_s1] ss:$0 sm:$0xff] }
 0x31e   :  { %2706 = vmatpush3.bf16.msra.mxu1 %v2505_v6  ;;  %1079 = vmatprep.subr.bf16.mxu0 %v2901_v13 }
 0x31f   :  { %2707 = vmatprep.subr.bf16.mxu1 %v3627_v39 }
 0x321   :  { %1080 = vmatpush1.bf16.msra.mxu0 %v2899_v14 }
 0x322   :  { %2708 = vmatpush3.bf16.msra.mxu1 %v2506_v7  ;;  %1081 = vmatprep.subr.bf16.mxu0 %v2904_v15 }
 0x323   :  { %2709 = vmatprep.subr.bf16.mxu1 %v3627_v39 }
 0x325   :  { %1082 = vmatpush1.bf16.msra.mxu0 %v2902_v16 }
 0x326   :  { %2710 = vmatpush3.bf16.msra.mxu1 %v2507_v8  ;;  %1083 = vmatprep.subr.bf16.mxu0 %v2907_v23 }
 0x327   :  { %1224 = vmatprep.subr.bf16.mxu1 %v2913_v28 }
 0x329   :  { %2712 = vmatmul.mubr.bf16.vlgmr.msra.gmra.mrb[4].mxu1 %v4167_v34  ;;  %1084 = vmatpush1.bf16.msra.mxu0 %v2905_v24  ;;  %v2915_v34 = vld [vmem:[#allocation14 + $0x10] ss:$8 sps:$4 sm:$0xff]  }
 0x32a   :  { %1256 = vmatprep.mubr.bf16.mxu1 %v3613_v0  ;;  %1085 = vmatprep.subr.bf16.mxu0 %v2910_v25 }
 0x32b   :  { %1225 = vmatpush1.bf16.msra.mxu1 %v2911_v27 }
 0x32c   :  { %1226 = vmatprep.subr.bf16.mxu1 %v2917_v32 }
 0x32d   :  { %1086 = vmatpush1.bf16.msra.mxu0 %v2908_v26 }
 0x32e   :  { %2715 = vmatprep.subr.bf16.mxu0 %v3627_v39 }
 0x32f   :  { %1227 = vmatpush1.bf16.msra.mxu1 %v2915_v34 }
 0x330   :  { %1104 = vmatmul.mubr.bf16.vlgmr.msra.gmra.mrb[8].mxu0 %v4243_v30  ;;  %1228 = vmatprep.subr.bf16.mxu1 %v2921_v38 }
 0x331   :  { %2716 = vmatpush3.bf16.msra.mxu0 %v2914_v31  ;;  %2731 = vmatprep.mubr.msk.bf16.mxu0 %vm3628_vm0, %v3627_v39 }
 0x332   :  { %2717 = vmatprep.subr.bf16.mxu0 %v3627_v39 }
 0x333   :  { %1229 = vmatpush1.bf16.msra.mxu1 %v2919_v40 }
 0x334   :  { %1230 = vmatprep.subr.bf16.mxu1 %v2925_v42 }
 0x335   :  { %2718 = vmatpush3.bf16.msra.mxu0 %v2918_v37 }
 0x336   :  { %2719 = vmatprep.subr.bf16.mxu0 %v3627_v39 }
 0x337   :  { %1231 = vmatpush1.bf16.msra.mxu1 %v2923_v43  ;;  %v2951_v43 = vld [vmem:[#allocation22] ss:$8 sps:$4 sm:$0xff]  }
 0x338   :  { %1232 = vmatprep.subr.bf16.mxu1 %v2929_v45  ;;  %v2944_v45 = vld [vmem:[#allocation19 + $0x8] sm:$0xff]  }
 0x339   :  { %2720 = vmatpush3.bf16.msra.mxu0 %v2922_v41  ;;  %v2943_v41 = vld [vmem:[#allocation19] sm:$0xff]  }
 0x33a   :  { %2721 = vmatprep.subr.bf16.mxu0 %v3627_v39 }
 0x33b   :  { %1233 = vmatpush1.bf16.msra.mxu1 %v2927_v46  ;;  %v2954_v46 = vld [vmem:[#allocation22 + $0x10] ss:$8 sps:$4 sm:$0xff]  }
 0x33c   :  { %1234 = vmatprep.subr.bf16.mxu1 %v2933_v48  ;;  %v2957_v48 = vld [vmem:[#allocation22 + $0x20] ss:$8 sps:$4 sm:$0xff]  }
 0x33d   :  { %2722 = vmatpush3.bf16.msra.mxu0 %v2926_v44  ;;  %v2956_v44 = vld [vmem:[#allocation22 + $0x14] ss:$8 sps:$4 sm:$0xff]  }
 0x33e   :  { %2723 = vmatprep.subr.bf16.mxu0 %v3627_v39 }
 0x33f   :  { %1235 = vmatpush1.bf16.msra.mxu1 %v2931_v49  ;;  %v2946_v49 = vld [vmem:[#allocation19 + $0x18] sm:$0xff]  }
 0x340   :  { %1236 = vmatprep.subr.bf16.mxu1 %v2937_v51  ;;  %v2948_v51 = vld [vmem:[#allocation19 + $0x28] sm:$0xff]  }
 0x341   :  { %2724 = vmatpush3.bf16.msra.mxu0 %v2930_v47  ;;  %v2959_v47 = vld [vmem:[#allocation22 + $0x24] ss:$8 sps:$4 sm:$0xff]  }
 0x342   :  { %2725 = vmatprep.subr.bf16.mxu0 %v3627_v39 }
 0x343   :  { %1237 = vmatpush1.bf16.msra.mxu1 %v2935_v52  ;;  %v2949_v52 = vld [vmem:[#allocation19 + $0x30] sm:$0xff]  }
 0x344   :  { %1238 = vmatprep.subr.bf16.mxu1 %v2941_v54 }
 0x345   :  { %2726 = vmatpush3.bf16.msra.mxu0 %v2934_v50  ;;  %v2947_v50 = vld [vmem:[#allocation19 + $0x20] sm:$0xff]  }
 0x346   :  { %2727 = vmatprep.subr.bf16.mxu0 %v3627_v39 }
 0x347   :  { %1239 = vmatpush1.bf16.msra.mxu1 %v2939_v55 }
 0x348   :  { %2735 = vmatprep.subr.bf16.mxu1 %v3627_v39 }
 0x349   :  { %2728 = vmatpush3.bf16.msra.mxu0 %v2938_v53  ;;  %v2950_v53 = vld [vmem:[#allocation19 + $0x38] sm:$0xff]  }
 0x34a   :  { %2729 = vmatprep.subr.bf16.mxu0 %v3627_v39 }
 0x34d   :  { %2730 = vmatpush3.bf16.msra.mxu0 %v2942_v56 }
 0x34e   :  { %1606 = vmatprep.subr.bf16.mxu0 %v2953_v57 }
 0x3dc   :  { %v724_v63 = vpop.f32.mrb[0].mxu1 }
 0x3dd   :  { %v725_v17 = vadd.f32 %v724_v63, %v4170_v35  ;;  %v726_v18 = vpop.f32.mrb[1].mxu1  ;;  %v2963_v63 = vld [vmem:[#allocation22 + $0x40] ss:$8 sps:$4 sm:$0xff]  }
 0x3de   :  { %v728_v20 = vpop.f32.mrb[2].mxu1  ;;  %v727_v3 = vadd.f32 %v726_v18, %v4172_v36  ;;  %v2499_v36 = vld [vmem:[%s4471_s8] ss:$0 sm:$0xff] }
 0x3df   :  { %v743_v1 = vadd.f32 %v736_v62, %v725_v17  ;;  %v729_v2 = vpop.f32.mrb[3].mxu1  ;;  %v2965_v62 = vld [vmem:[#allocation22 + $0x44] ss:$8 sps:$4 sm:$0xff]   ;;  %v2968_v17 = vld [vmem:[#allocation22 + $0x54] ss:$8 sps:$4 sm:$0xff]  }
 0x3e0   :  { %v744_v22 = vadd.f32 %v740_v4, %v727_v3  ;;  %v2966_v18 = vld [vmem:[#allocation22 + $0x50] ss:$8 sps:$4 sm:$0xff]   ;;  %v2969_v20 = vld [vmem:[#allocation22 + $0x60] ss:$8 sps:$4 sm:$0xff]   ;;  %v2977_v3 = vld [vmem:[#allocation20 + $0x4] ss:$8 sps:$4 sm:$0xff]  }
 0x3e1   :  { %v2488_v21 = vmul.f32 -1.442695, %v743_v1  ;;  %v2974_v1 = vld [vmem:[#allocation22 + $0x74] ss:$8 sps:$4 sm:$0xff]   ;;  %v2972_v2 = vld [vmem:[#allocation22 + $0x70] ss:$8 sps:$4 sm:$0xff]  }
 0x3e2   :  { %v2489_v9 = vmul.f32 -1.442695, %v744_v22  ;;  %v4294_v4 = vld [vmem:[#allocation26 + $0x10] sm:$0xff] }
 0x3e3   :  { %3015 = vpow2.f32 %v2488_v21  ;;  %v862_v5 = vpop.f32.mrb[4].mxu0  ;;  %v2975_v21 = vld [vmem:[#allocation20] ss:$8 sps:$4 sm:$0xff]   ;;  %v4299_v22 = vpack.c.bf16 %v4294_v4, %v4294_v4 }
 0x3e4   :  { %v2693_v6 = vpop.f32.mrb[5].mxu0  ;;  %3017 = vpow2.f32 %v2489_v9  ;;  %v863_v15 = vadd.f32 %v2490_v12, %v862_v5  ;;  %v2978_v5 = vld [vmem:[#allocation23] sm:$0xff]   ;;  %v2987_v12 = vld [vmem:[#allocation20 + $0x30] ss:$8 sps:$4 sm:$0xff]  }
 0x3e5   :  { %v865_v7 = vpop.f32.mrb[6].mxu0  ;;  %v2981_v6 = vld [vmem:[#allocation20 + $0x14] ss:$8 sps:$4 sm:$0xff]   ;;  %v2985_v9 = vld [vmem:[#allocation20 + $0x24] ss:$8 sps:$4 sm:$0xff]  }
 0x3e6   :  { %v2694_v8 = vpop.f32.mrb[7].mxu0  ;;  %v2979_v7 = vld [vmem:[#allocation20 + $0x10] ss:$8 sps:$4 sm:$0xff]  }
 0x3e7   :  { %v2982_v8 = vld [vmem:[#allocation23 + $0x8] sm:$0xff]  }
 0x3ed   :  { %v3016_v35 = vpop.eup %3015 }
 0x3ee   :  { %v751_v10 = vadd.f32 1.0, %v3016_v35  ;;  %v3018_v11 = vpop.eup %3017  ;;  %v2983_v35 = vld [vmem:[#allocation20 + $0x20] ss:$8 sps:$4 sm:$0xff]  }
 0x3ef   :  { %v752_v13 = vadd.f32 1.0, %v3018_v11  ;;  %v2989_v11 = vld [vmem:[#allocation20 + $0x34] ss:$8 sps:$4 sm:$0xff]  }
 0x3f0   :  { %3019 = vrcp.f32 %v751_v10  ;;  %v2986_v10 = vld [vmem:[#allocation23 + $0x10] sm:$0xff]  }
 0x3f1   :  { %3021 = vrcp.f32 %v752_v13  ;;  %v2993_v13 = vld [vmem:[#allocation20 + $0x44] ss:$8 sps:$4 sm:$0xff]  }
 0x3fa   :  { %v3020_v24 = vpop.eup %3019 }
 0x3fb   :  { %v3022_v31 = vpop.eup %3021 }
 0x3fc   :  { %v957_v14 = vpop.f32.mrb[4].mxu1  ;;  %v966_v32 = vsub.f32 1.0, %v3022_v31  ;;  %v968_v38 = vmul.f32 %v3022_v31, %v4163_v33  ;;  %v2945_v33 = vld [vmem:[#allocation19 + $0x10] sm:$0xff]  }
 0x3fd   :  { %v958_v16 = vadd.f32 %v2499_v36, %v957_v14  ;;  %v2713_v23 = vpop.f32.mrb[5].mxu1  ;;  %v2990_v36 = vld [vmem:[#allocation23 + $0x18] sm:$0xff]   ;;  %v2991_v14 = vld [vmem:[#allocation20 + $0x40] ss:$8 sps:$4 sm:$0xff]  }
 0x3fe   :  { %v960_v25 = vpop.f32.mrb[6].mxu1  ;;  %v2995_v23 = vld [vmem:[#allocation20 + $0x50] ss:$8 sps:$4 sm:$0xff]  }
 0x3ff   :  { %v963_v26 = vmul.f32 %v3020_v24, %v958_v16  ;;  %v2714_v27 = vpop.f32.mrb[7].mxu1  ;;  %v2997_v16 = vld [vmem:[#allocation20 + $0x54] ss:$8 sps:$4 sm:$0xff]   ;;  %v2998_v24 = vld [vmem:[#allocation23 + $0x28] sm:$0xff]   ;;  %v3003_v31 = vld [vmem:[#allocation20 + $0x70] ss:$8 sps:$4 sm:$0xff]  }
 0x400   :  { %v3001_v25 = vld [vmem:[#allocation20 + $0x64] ss:$8 sps:$4 sm:$0xff]   ;;  %v3002_v27 = vld [vmem:[#allocation23 + $0x30] sm:$0xff]  }
 0x401   :  { %v964_v28 = vadd.f32 %v963_v26, %v863_v15  ;;  %v2994_v15 = vld [vmem:[#allocation23 + $0x20] sm:$0xff]  }
 0x402   :  { %v2999_v26 = vld [vmem:[#allocation20 + $0x60] ss:$8 sps:$4 sm:$0xff]  }
 0x403   :  { %3023 = vtanh.f32 %v964_v28  ;;  %v4290_v54 = vpop.f32.mrb[8].mxu0  ;;  %v3005_v28 = vld [vmem:[#allocation20 + $0x74] ss:$8 sps:$4 sm:$0xff]  }
 0x404   :  { %v4292_v55 = vpop.f32.mrb[9].mxu0 }
 0x405   :  { %v1109_v56 = vpop.f32.mrb[10].mxu0 }
 0x406   :  { %v1110_v57 = vpop.f32.mrb[11].mxu0 }
 0x40d   :  { %v3024_v34 = vpop.eup %3023 }
 0x40e   :  { %v967_v37 = vmul.f32 %v3024_v34, %v966_v32  ;;  %v3006_v32 = vld [vmem:[#allocation23 + $0x38] sm:$0xff]  }
 0x40f   :  { %v1265_v34 = vld [vmem:[%s4414_s13] sm:$0x3] }
 0x410   :  { %v969_v40 = vadd.f32 %v968_v38, %v967_v37  ;;  %v1270_v37 = vrot.slane %v1265_v34, %v4259_v60 }
 0x412   :  { %970 = vst [vmem:[#allocation29] sm:$0xff] %v969_v40  ;;  %v971_v42 = vpack.c.bf16 %v969_v40, %v969_v40 }
 0x414   :  { %1257 = vmatmul.mubr.bf16.vlgmr.msra.gmra.mrb[8].mxu1 %v971_v42  ;;  %2732 = vmatmul.mubr.bf16.vlgmr.msra.gmra.mrb[12].mxu0 %v971_v42 }
 0x415   :  { %2736 = vmatpush3.bf16.msra.mxu1 %v2943_v41  ;;  %2751 = vmatprep.mubr.msk.bf16.mxu1 %vm3628_vm0, %v3627_v39 }
 0x416   :  { %2737 = vmatprep.subr.bf16.mxu1 %v3627_v39  ;;  %1607 = vmatpush1.bf16.msra.mxu0 %v2951_v43 }
 0x417   :  { %1608 = vmatprep.subr.bf16.mxu0 %v2956_v44  ;;  %1638 = vmatprep.mubr.bf16.mxu0 %v3613_v0 }
 0x419   :  { %2738 = vmatpush3.bf16.msra.mxu1 %v2944_v45 }
 0x41a   :  { %2739 = vmatprep.subr.bf16.mxu1 %v3627_v39  ;;  %1609 = vmatpush1.bf16.msra.mxu0 %v2954_v46 }
 0x41b   :  { %1610 = vmatprep.subr.bf16.mxu0 %v2959_v47 }
 0x41d   :  { %2740 = vmatpush3.bf16.msra.mxu1 %v2945_v33 }
 0x41e   :  { %2741 = vmatprep.subr.bf16.mxu1 %v3627_v39  ;;  %1611 = vmatpush1.bf16.msra.mxu0 %v2957_v48 }
 0x41f   :  { %1612 = vmatprep.subr.bf16.mxu0 %v2962_v58  ;;  %v2542_v58 = vld [vmem:[%s4415_s14] ss:$0 sm:$0xff] }
 0x421   :  { %2742 = vmatpush3.bf16.msra.mxu1 %v2946_v49 }
 0x422   :  { %2743 = vmatprep.subr.bf16.mxu1 %v3627_v39  ;;  %1613 = vmatpush1.bf16.msra.mxu0 %v2960_v61 }
 0x423   :  { %1614 = vmatprep.subr.bf16.mxu0 %v2965_v62 }
 0x425   :  { %2744 = vmatpush3.bf16.msra.mxu1 %v2947_v50  ;;  %v1274_v50 = vrot.slane %v1265_v34, %v4267_v19 }
 0x426   :  { %2745 = vmatprep.subr.bf16.mxu1 %v3627_v39  ;;  %1615 = vmatpush1.bf16.msra.mxu0 %v2963_v63 }
 0x427   :  { %1616 = vmatprep.subr.bf16.mxu0 %v2968_v17 }
 0x429   :  { %2746 = vmatpush3.bf16.msra.mxu1 %v2948_v51 }
 0x42a   :  { %2747 = vmatprep.subr.bf16.mxu1 %v3627_v39  ;;  %1617 = vmatpush1.bf16.msra.mxu0 %v2966_v18 }
 0x42d   :  { %2748 = vmatpush3.bf16.msra.mxu1 %v2949_v52 }
 0x42e   :  { %2749 = vmatprep.subr.bf16.mxu1 %v3627_v39 }
 0x431   :  { %2750 = vmatpush3.bf16.msra.mxu1 %v2950_v53 }
 0x432   :  { %1759 = vmatprep.subr.bf16.mxu1 %v2977_v3 }
 0x434   :  { %2752 = vmatmul.mubr.bf16.vlgmr.msra.gmra.mrb[12].mxu1 %v4243_v30  ;;  %v2971_v30 = vld [vmem:[#allocation22 + $0x64] ss:$8 sps:$4 sm:$0xff]  }
 0x435   :  { %1791 = vmatprep.mubr.bf16.mxu1 %v3613_v0  ;;  %1618 = vmatprep.subr.bf16.mxu0 %v2971_v30 }
 0x436   :  { %1619 = vmatpush1.bf16.msra.mxu0 %v2969_v20  ;;  %1760 = vmatpush1.bf16.msra.mxu1 %v2975_v21 }
 0x437   :  { %1620 = vmatprep.subr.bf16.mxu0 %v2974_v1  ;;  %1761 = vmatprep.subr.bf16.mxu1 %v2981_v6 }
 0x43a   :  { %1621 = vmatpush1.bf16.msra.mxu0 %v2972_v2  ;;  %1762 = vmatpush1.bf16.msra.mxu1 %v2979_v7 }
 0x43b   :  { %2755 = vmatprep.subr.bf16.mxu0 %v3627_v39  ;;  %1763 = vmatprep.subr.bf16.mxu1 %v2985_v9  ;;  %v3007_v9 = vld [vmem:[#allocation25] sm:$0xff]  }
 0x43d   :  { %1639 = vmatmul.mubr.bf16.vlgmr.msra.gmra.mrb[16].mxu0 %v4299_v22 }
 0x43e   :  { %2756 = vmatpush3.bf16.msra.mxu0 %v2978_v5  ;;  %2771 = vmatprep.mubr.msk.bf16.mxu0 %vm3628_vm0, %v3627_v39 }
 0x43f   :  { %2757 = vmatprep.subr.bf16.mxu0 %v3627_v39  ;;  %1764 = vmatpush1.bf16.msra.mxu1 %v2983_v35 }
 0x440   :  { %1765 = vmatprep.subr.bf16.mxu1 %v2989_v11  ;;  %v3009_v11 = vld [vmem:[#allocation25 + $0x10] sm:$0xff]  }
 0x442   :  { %2758 = vmatpush3.bf16.msra.mxu0 %v2982_v8 }
 0x443   :  { %2759 = vmatprep.subr.bf16.mxu0 %v3627_v39  ;;  %1766 = vmatpush1.bf16.msra.mxu1 %v2987_v12  ;;  %v3010_v12 = vld [vmem:[#allocation25 + $0x18] sm:$0xff]  }
 0x444   :  { %1767 = vmatprep.subr.bf16.mxu1 %v2993_v13  ;;  %v3013_v13 = vld [vmem:[#allocation25 + $0x30] sm:$0xff]  }
 0x446   :  { %2760 = vmatpush3.bf16.msra.mxu0 %v2986_v10  ;;  %v3008_v10 = vld [vmem:[#allocation25 + $0x8] sm:$0xff]  }
 0x447   :  { %2761 = vmatprep.subr.bf16.mxu0 %v3627_v39  ;;  %1768 = vmatpush1.bf16.msra.mxu1 %v2991_v14  ;;  %v3014_v14 = vld [vmem:[#allocation25 + $0x38] sm:$0xff]  }
 0x448   :  { %1769 = vmatprep.subr.bf16.mxu1 %v2997_v16 }
 0x44a   :  { %2762 = vmatpush3.bf16.msra.mxu0 %v2990_v36  ;;  %v3012_v36 = vld [vmem:[#allocation25 + $0x28] sm:$0xff]  }
 0x44b   :  { %2763 = vmatprep.subr.bf16.mxu0 %v3627_v39  ;;  %1770 = vmatpush1.bf16.msra.mxu1 %v2995_v23 }
 0x44c   :  { %1771 = vmatprep.subr.bf16.mxu1 %v3001_v25  ;;  %v1800_v25 = vld [vmem:[%s4421_s20] sm:$0x3] }
 0x44e   :  { %2764 = vmatpush3.bf16.msra.mxu0 %v2994_v15 }
 0x44f   :  { %2765 = vmatprep.subr.bf16.mxu0 %v3627_v39  ;;  %1772 = vmatpush1.bf16.msra.mxu1 %v2999_v26  ;;  %v1805_v26 = vrot.slane %v1800_v25, %v4259_v60 }
 0x450   :  { %1773 = vmatprep.subr.bf16.mxu1 %v3005_v28 }
 0x452   :  { %2766 = vmatpush3.bf16.msra.mxu0 %v2998_v24 }
 0x453   :  { %2767 = vmatprep.subr.bf16.mxu0 %v3627_v39  ;;  %1774 = vmatpush1.bf16.msra.mxu1 %v3003_v31 }
 0x454   :  { %2775 = vmatprep.subr.bf16.mxu1 %v3627_v39 }
 0x456   :  { %2768 = vmatpush3.bf16.msra.mxu0 %v3002_v27 }
 0x457   :  { %2769 = vmatprep.subr.bf16.mxu0 %v3627_v39 }
 0x45a   :  { %2770 = vmatpush3.bf16.msra.mxu0 %v3006_v32 }
 0x4e7   :  { %v1258_v38 = vpop.f32.mrb[8].mxu1  ;;  %v1396_v40 = vpop.f32.mrb[12].mxu0 }
 0x4e8   :  { %v1259_v41 = vadd.f32 %v1258_v38, %v4290_v54  ;;  %v1260_v42 = vpop.f32.mrb[9].mxu1  ;;  %v2733_v43 = vpop.f32.mrb[13].mxu0  ;;  %v1397_v30 = vadd.f32 %v2542_v58, %v1396_v40 }
 0x4e9   :  { %v1261_v44 = vadd.f32 %v1260_v42, %v4292_v55  ;;  %v1262_v45 = vpop.f32.mrb[10].mxu1  ;;  %v1399_v46 = vpop.f32.mrb[14].mxu0  ;;  %v2551_v55 = vld [vmem:[%s4416_s15] ss:$0 sm:$0xff]  ;;  %v1809_v43 = vrot.slane %v1800_v25, %v4267_v19 }
 0x4ea   :  { %v1277_v47 = vadd.f32 %v1270_v37, %v1259_v41  ;;  %v1263_v33 = vpop.f32.mrb[11].mxu1  ;;  %v2734_v48 = vpop.f32.mrb[15].mxu0 }
 0x4eb   :  { %v1278_v51 = vadd.f32 %v1274_v50, %v1261_v44  ;;  %v2603_v48 = vld [vmem:[%s4423_s22] ss:$0 sm:$0xff] }
 0x4ec   :  { %v2540_v49 = vmul.f32 -1.442695, %v1277_v47  ;;  %v2594_v50 = vld [vmem:[%s4422_s21] ss:$0 sm:$0xff] }
 0x4ed   :  { %v2541_v52 = vmul.f32 -1.442695, %v1278_v51 }
 0x4ee   :  { %3025 = vpow2.f32 %v2540_v49 }
 0x4ef   :  { %3027 = vpow2.f32 %v2541_v52 }
 0x4f8   :  { %v3026_v53 = vpop.eup %3025 }
 0x4f9   :  { %v1285_v56 = vadd.f32 1.0, %v3026_v53  ;;  %v3028_v54 = vpop.eup %3027 }
 0x4fa   :  { %v1286_v57 = vadd.f32 1.0, %v3028_v54 }
 0x4fb   :  { %3029 = vrcp.f32 %v1285_v56 }
 0x4fc   :  { %3031 = vrcp.f32 %v1286_v57 }
 0x505   :  { %v3030_v17 = vpop.eup %3029 }
 0x506   :  { %v3032_v21 = vpop.eup %3031 }
 0x507   :  { %v1491_v61 = vpop.f32.mrb[12].mxu1  ;;  %v1500_v3 = vsub.f32 1.0, %v3032_v21  ;;  %v1502_v7 = vmul.f32 %v3032_v21, %v4238_v29  ;;  %v3011_v29 = vld [vmem:[#allocation25 + $0x20] sm:$0xff]  }
 0x508   :  { %v1492_v62 = vadd.f32 %v2551_v55, %v1491_v61  ;;  %v2753_v63 = vpop.f32.mrb[13].mxu1 }
 0x509   :  { %v1494_v18 = vpop.f32.mrb[14].mxu1 }
 0x50a   :  { %v1497_v20 = vmul.f32 %v3030_v17, %v1492_v62  ;;  %v2754_v1 = vpop.f32.mrb[15].mxu1 }
 0x50c   :  { %v1498_v2 = vadd.f32 %v1497_v20, %v1397_v30 }
 0x50e   :  { %3033 = vtanh.f32 %v1498_v2 }
 0x510   :  { %v1640_v15 = vpop.f32.mrb[16].mxu0 }
 0x511   :  { %v1642_v16 = vpop.f32.mrb[17].mxu0 }
 0x512   :  { %v1644_v23 = vpop.f32.mrb[18].mxu0 }
 0x513   :  { %v1645_v24 = vpop.f32.mrb[19].mxu0 }
 0x518   :  { %v3034_v5 = vpop.eup %3033 }
 0x519   :  { %v1501_v6 = vmul.f32 %v3034_v5, %v1500_v3 }
 0x51b   :  { %v1503_v8 = vadd.f32 %v1502_v7, %v1501_v6 }
 0x51d   :  { %1505 = vst [vmem:[#allocation29 + $0x8] sm:$0xff] %v1503_v8  ;;  %v1506_v35 = vpack.c.bf16 %v1503_v8, %v1503_v8 }
 0x51f   :  { %1792 = vmatmul.mubr.bf16.vlgmr.msra.gmra.mrb[16].mxu1 %v1506_v35  ;;  %2772 = vmatmul.mubr.bf16.vlgmr.msra.gmra.mrb[20].mxu0 %v1506_v35 }
 0x520   :  { %2776 = vmatpush3.bf16.msra.mxu1 %v3007_v9  ;;  %2791 = vmatprep.mubr.msk.bf16.mxu1 %vm3628_vm0, %v3627_v39 }
 0x521   :  { %2777 = vmatprep.subr.bf16.mxu1 %v3627_v39 }
 0x524   :  { %2778 = vmatpush3.bf16.msra.mxu1 %v3008_v10 }
 0x525   :  { %2779 = vmatprep.subr.bf16.mxu1 %v3627_v39 }
 0x528   :  { %2780 = vmatpush3.bf16.msra.mxu1 %v3009_v11 }
 0x529   :  { %2781 = vmatprep.subr.bf16.mxu1 %v3627_v39 }
 0x52c   :  { %2782 = vmatpush3.bf16.msra.mxu1 %v3010_v12 }
 0x52d   :  { %2783 = vmatprep.subr.bf16.mxu1 %v3627_v39 }
 0x530   :  { %2784 = vmatpush3.bf16.msra.mxu1 %v3011_v29 }
 0x531   :  { %2785 = vmatprep.subr.bf16.mxu1 %v3627_v39 }
 0x534   :  { %2786 = vmatpush3.bf16.msra.mxu1 %v3012_v36 }
 0x535   :  { %2787 = vmatprep.subr.bf16.mxu1 %v3627_v39 }
 0x538   :  { %2788 = vmatpush3.bf16.msra.mxu1 %v3013_v13 }
 0x539   :  { %2789 = vmatprep.subr.bf16.mxu1 %v3627_v39 }
 0x53c   :  { %2790 = vmatpush3.bf16.msra.mxu1 %v3014_v14 }
 0x53f   :  { %2792 = vmatmul.mubr.bf16.vlgmr.msra.gmra.mrb[20].mxu1 %v4299_v22 }
 0x5f2   :  { %v1793_v27 = vpop.f32.mrb[16].mxu1  ;;  %v1931_v28 = vpop.f32.mrb[20].mxu0 }
 0x5f3   :  { %v1794_v31 = vadd.f32 %v1793_v27, %v1640_v15  ;;  %v1795_v32 = vpop.f32.mrb[17].mxu1  ;;  %v2773_v34 = vpop.f32.mrb[21].mxu0  ;;  %v1932_v55 = vadd.f32 %v2594_v50, %v1931_v28 }
 0x5f4   :  { %v1796_v37 = vadd.f32 %v1795_v32, %v1642_v16  ;;  %v1797_v39 = vpop.f32.mrb[18].mxu1  ;;  %v1934_v38 = vpop.f32.mrb[22].mxu0 }
 0x5f5   :  { %v1812_v40 = vadd.f32 %v1805_v26, %v1794_v31  ;;  %v1798_v22 = vpop.f32.mrb[19].mxu1  ;;  %v2774_v41 = vpop.f32.mrb[23].mxu0 }
 0x5f6   :  { %v1813_v44 = vadd.f32 %v1809_v43, %v1796_v37 }
 0x5f7   :  { %v2592_v42 = vmul.f32 -1.442695, %v1812_v40 }
 0x5f8   :  { %v2593_v45 = vmul.f32 -1.442695, %v1813_v44 }
 0x5f9   :  { %3035 = vpow2.f32 %v2592_v42 }
 0x5fa   :  { %3037 = vpow2.f32 %v2593_v45 }
 0x603   :  { %v3036_v46 = vpop.eup %3035 }
 0x604   :  { %v1820_v47 = vadd.f32 1.0, %v3036_v46  ;;  %v3038_v33 = vpop.eup %3037 }
 0x605   :  { %v1821_v49 = vadd.f32 1.0, %v3038_v33 }
 0x606   :  { %3039 = vrcp.f32 %v1820_v47 }
 0x607   :  { %3041 = vrcp.f32 %v1821_v49 }
 0x610   :  { %v3040_v56 = vpop.eup %3039 }
 0x611   :  { %v3042_v62 = vpop.eup %3041 }
 0x612   :  { %v2026_v51 = vpop.f32.mrb[20].mxu1  ;;  %v2035_v63 = vsub.f32 1.0, %v3042_v62  ;;  %v2037_v18 = vmul.f32 %v3042_v62, %v4294_v4 }
 0x613   :  { %v2027_v52 = vadd.f32 %v2603_v48, %v2026_v51  ;;  %v2793_v53 = vpop.f32.mrb[21].mxu1 }
 0x614   :  { %v2029_v54 = vpop.f32.mrb[22].mxu1 }
 0x615   :  { %v2032_v57 = vmul.f32 %v3040_v56, %v2027_v52  ;;  %v2794_v58 = vpop.f32.mrb[23].mxu1 }
 0x617   :  { %v2033_v61 = vadd.f32 %v2032_v57, %v1932_v55 }
 0x619   :  { %3043 = vtanh.f32 %v2033_v61 }
 0x623   :  { %v3044_v17 = vpop.eup %3043 }
 0x624   :  { %v2036_v30 = vmul.f32 %v3044_v17, %v2035_v63 }
 0x626   :  { %v4348_v20 = vadd.f32 %v2037_v18, %v2036_v30 }
 0x628   :  { %2040 = vst [vmem:[#allocation29 + $0x10] sm:$0xff] %v4348_v20 }
 0x629   :  { %3589 = dma.done.wait [#allocation5], 8192 }
 0x62a   :  { %3590 = vsyncadd [#allocation5], 4294959104  ;;  %2184 = vmatprep.mubr.bf16.mxu0 %v3613_v0  ;;  %2225 = vmatprep.mubr.bf16.mxu1 %v3613_v0  ;;  %v2047_v1 = vld [vmem:[#allocation3 + $0x8] sm:$0xff]  ;;  %v2049_v2 = vld [vmem:[#allocation3 + $0x18] sm:$0xff]  ;;  %v4355_v41 = vpack.c.bf16 %v4348_v20, %v4348_v20  ;;  %s3629_s21 = smov [#allocation29]  }
 0x62b   :  { %v2046_v21 = vld [vmem:[#allocation3] sm:$0xff]  ;;  %2152 = vmatprep.subr.bf16.mxu0 %v2047_v1  ;;  %2193 = vmatprep.subr.bf16.mxu1 %v2049_v2  ;;  %v2048_v3 = vld [vmem:[#allocation3 + $0x10] sm:$0xff]  ;;  %v2055_v5 = vld [vmem:[#allocation3 + $0x48] sm:$0xff]  ;;  %s2339_s22 = sshll.u32 %s3629_s21, 4  ;;  %s2340_s22 = int_to_ptr.vmem [resolvable:$true] %s2339_s22 }
 0x62c   :  { %v2057_v6 = vld [vmem:[#allocation3 + $0x58] sm:$0xff]  ;;  %2153 = vmatpush1.bf16.msra.mxu0 %v2046_v21  ;;  %2194 = vmatpush1.bf16.msra.mxu1 %v2048_v3  ;;  %v2054_v4 = vld [vmem:[#allocation3 + $0x40] sm:$0xff]  ;;  %v2056_v7 = vld [vmem:[#allocation3 + $0x50] sm:$0xff]  ;;  %s3513_s16 = scalar_lea.vmem %s2340_s22, 384  ;;  %p3518_p2 = scmp.lt.s32.totalorder %s2340_s22, %s2340_s22 }
 0x62d   :  { %2154 = vmatprep.subr.bf16.mxu0 %v2055_v5  ;;  %2195 = vmatprep.subr.bf16.mxu1 %v2057_v6  ;;  %v2063_v8 = vld [vmem:[#allocation3 + $0x88] sm:$0xff]  ;;  %v2065_v9 = vld [vmem:[#allocation3 + $0x98] sm:$0xff]  ;;  %v2062_v35 = vld [vmem:[#allocation3 + $0x80] sm:$0xff]  ;;  %p3514_p1 = scmp.ne.s32.totalorder %s2340_s22, %s3513_s16  ;;  %p3519_p3 = scmp.lt.s32.totalorder %s3513_s16, %s3513_s16 }
 0x62e   :  { %v2064_v10 = vld [vmem:[#allocation3 + $0x90] sm:$0xff]  ;;  %v2071_v11 = vld [vmem:[#allocation3 + $0xc8] sm:$0xff]  ;;  %v2073_v12 = vld [vmem:[#allocation3 + $0xd8] sm:$0xff] }
 0x62f   :  { %v2070_v29 = vld [vmem:[#allocation3 + $0xc0] sm:$0xff]  ;;  %v2072_v36 = vld [vmem:[#allocation3 + $0xd0] sm:$0xff]  ;;  %v2079_v13 = vld [vmem:[#allocation3 + $0x108] sm:$0xff]  ;;  %p3520_p4 = por %p3519_p3, %p3518_p2 }
 0x630   :  { %2155 = vmatpush1.bf16.msra.mxu0 %v2054_v4  ;;  %2196 = vmatpush1.bf16.msra.mxu1 %v2056_v7  ;;  %v2081_v14 = vld [vmem:[#allocation3 + $0x118] sm:$0xff]  ;;  %v2078_v15 = vld [vmem:[#allocation3 + $0x100] sm:$0xff]  ;;  %v2080_v16 = vld [vmem:[#allocation3 + $0x110] sm:$0xff] }
 0x631   :  { %2156 = vmatprep.subr.bf16.mxu0 %v2063_v8  ;;  %2197 = vmatprep.subr.bf16.mxu1 %v2065_v9  ;;  %v2087_v23 = vld [vmem:[#allocation3 + $0x148] sm:$0xff]  ;;  %v2089_v24 = vld [vmem:[#allocation3 + $0x158] sm:$0xff]  ;;  %v2086_v25 = vld [vmem:[#allocation3 + $0x140] sm:$0xff]  ;;  %p3521_p5 = pnand %p3520_p4, %p3514_p1 }
 0x632   :  { %v2088_v26 = vld [vmem:[#allocation3 + $0x150] sm:$0xff]  ;;  %v2095_v27 = vld [vmem:[#allocation3 + $0x188] sm:$0xff]  ;;  %v2097_v28 = vld [vmem:[#allocation3 + $0x198] sm:$0xff] }
 0x633   :  { %v2094_v31 = vld [vmem:[#allocation3 + $0x180] sm:$0xff]  ;;  %v2096_v32 = vld [vmem:[#allocation3 + $0x190] sm:$0xff]  ;;  %v2103_v34 = vld [vmem:[#allocation3 + $0x1c8] sm:$0xff] }
 0x634   :  { %2157 = vmatpush1.bf16.msra.mxu0 %v2062_v35  ;;  %2198 = vmatpush1.bf16.msra.mxu1 %v2064_v10  ;;  %v2105_v37 = vld [vmem:[#allocation3 + $0x1d8] sm:$0xff]  ;;  %v2102_v39 = vld [vmem:[#allocation3 + $0x1c0] sm:$0xff]  ;;  %v2104_v38 = vld [vmem:[#allocation3 + $0x1d0] sm:$0xff] }
 0x635   :  { %2158 = vmatprep.subr.bf16.mxu0 %v2071_v11  ;;  %2199 = vmatprep.subr.bf16.mxu1 %v2073_v12  ;;  %v2051_v40 = vld [vmem:[#allocation3 + $0x28] sm:$0xff]  ;;  %v2053_v22 = vld [vmem:[#allocation3 + $0x38] sm:$0xff]  ;;  %v2050_v42 = vld [vmem:[#allocation3 + $0x20] sm:$0xff] }
 0x636   :  { %v2052_v43 = vld [vmem:[#allocation3 + $0x30] sm:$0xff]  ;;  %v2059_v44 = vld [vmem:[#allocation3 + $0x68] sm:$0xff]  ;;  %v2061_v45 = vld [vmem:[#allocation3 + $0x78] sm:$0xff] }
 0x637   :  { %v2058_v46 = vld [vmem:[#allocation3 + $0x60] sm:$0xff]  ;;  %v2060_v47 = vld [vmem:[#allocation3 + $0x70] sm:$0xff]  ;;  %v2067_v33 = vld [vmem:[#allocation3 + $0xa8] sm:$0xff] }
 0x638   :  { %2159 = vmatpush1.bf16.msra.mxu0 %v2070_v29  ;;  %2200 = vmatpush1.bf16.msra.mxu1 %v2072_v36  ;;  %v2069_v48 = vld [vmem:[#allocation3 + $0xb8] sm:$0xff]  ;;  %v2066_v49 = vld [vmem:[#allocation3 + $0xa0] sm:$0xff]  ;;  %v2068_v50 = vld [vmem:[#allocation3 + $0xb0] sm:$0xff] }
 0x639   :  { %2160 = vmatprep.subr.bf16.mxu0 %v2079_v13  ;;  %2201 = vmatprep.subr.bf16.mxu1 %v2081_v14  ;;  %v2075_v51 = vld [vmem:[#allocation3 + $0xe8] sm:$0xff]  ;;  %v2077_v52 = vld [vmem:[#allocation3 + $0xf8] sm:$0xff]  ;;  %v2074_v53 = vld [vmem:[#allocation3 + $0xe0] sm:$0xff] }
 0x63a   :  { %v2076_v56 = vld [vmem:[#allocation3 + $0xf0] sm:$0xff]  ;;  %v2083_v54 = vld [vmem:[#allocation3 + $0x128] sm:$0xff]  ;;  %v2085_v55 = vld [vmem:[#allocation3 + $0x138] sm:$0xff] }
 0x63b   :  { %v2084_v57 = vld [vmem:[#allocation3 + $0x130] sm:$0xff]  ;;  %v2091_v58 = vld [vmem:[#allocation3 + $0x168] sm:$0xff]  ;;  %v2093_v61 = vld [vmem:[#allocation3 + $0x178] sm:$0xff] }
 0x63c   :  { %2161 = vmatpush1.bf16.msra.mxu0 %v2078_v15  ;;  %2202 = vmatpush1.bf16.msra.mxu1 %v2080_v16  ;;  %v2090_v62 = vld [vmem:[#allocation3 + $0x160] sm:$0xff]  ;;  %v2092_v63 = vld [vmem:[#allocation3 + $0x170] sm:$0xff]  ;;  %v2099_v17 = vld [vmem:[#allocation3 + $0x1a8] sm:$0xff] }
 0x63d   :  { %2162 = vmatprep.subr.bf16.mxu0 %v2087_v23  ;;  %2203 = vmatprep.subr.bf16.mxu1 %v2089_v24  ;;  %v2101_v18 = vld [vmem:[#allocation3 + $0x1b8] sm:$0xff]  ;;  %v2098_v30 = vld [vmem:[#allocation3 + $0x1a0] sm:$0xff]  ;;  %v2100_v20 = vld [vmem:[#allocation3 + $0x1b0] sm:$0xff] }
 0x63e   :  { %v2107_v1 = vld [vmem:[#allocation3 + $0x1e8] sm:$0xff]  ;;  %v2109_v2 = vld [vmem:[#allocation3 + $0x1f8] sm:$0xff]  ;;  %v2106_v21 = vld [vmem:[#allocation3 + $0x1e0] sm:$0xff] }
 0x63f   :  { %v2108_v3 = vld [vmem:[#allocation3 + $0x1f0] sm:$0xff] }
 0x640   :  { %2163 = vmatpush1.bf16.msra.mxu0 %v2086_v25  ;;  %2204 = vmatpush1.bf16.msra.mxu1 %v2088_v26 }
 0x641   :  { %2164 = vmatprep.subr.bf16.mxu0 %v2095_v27  ;;  %2205 = vmatprep.subr.bf16.mxu1 %v2097_v28 }
 0x644   :  { %2165 = vmatpush1.bf16.msra.mxu0 %v2094_v31  ;;  %2206 = vmatpush1.bf16.msra.mxu1 %v2096_v32 }
 0x645   :  { %2166 = vmatprep.subr.bf16.mxu0 %v2103_v34  ;;  %2207 = vmatprep.subr.bf16.mxu1 %v2105_v37 }
 0x648   :  { %2167 = vmatpush1.bf16.msra.mxu0 %v2102_v39  ;;  %2208 = vmatpush1.bf16.msra.mxu1 %v2104_v38 }
 0x649   :  { %2234 = vmatprep.subr.bf16.mxu0 %v2051_v40  ;;  %2275 = vmatprep.subr.bf16.mxu1 %v2053_v22 }
 0x64b   :  { %2185 = vmatmul.mubr.bf16.vlgmr.msra.gmra.mrb[24].mxu0 %v4355_v41  ;;  %2226 = vmatmul.mubr.bf16.vlgmr.msra.gmra.mrb[24].mxu1 %v4355_v41 }
 0x64c   :  { %2235 = vmatpush1.bf16.msra.mxu0 %v2050_v42  ;;  %2276 = vmatpush1.bf16.msra.mxu1 %v2052_v43 }
 0x64d   :  { %2236 = vmatprep.subr.bf16.mxu0 %v2059_v44  ;;  %2277 = vmatprep.subr.bf16.mxu1 %v2061_v45 }
 0x64e   :  { %2266 = vmatprep.mubr.bf16.mxu0 %v3613_v0  ;;  %2307 = vmatprep.mubr.bf16.mxu1 %v3613_v0  ;;  %v2082_v0 = vld [vmem:[#allocation3 + $0x120] sm:$0xff] }
 0x650   :  { %2237 = vmatpush1.bf16.msra.mxu0 %v2058_v46  ;;  %2278 = vmatpush1.bf16.msra.mxu1 %v2060_v47 }
 0x651   :  { %2238 = vmatprep.subr.bf16.mxu0 %v2067_v33  ;;  %2279 = vmatprep.subr.bf16.mxu1 %v2069_v48 }
 0x654   :  { %2239 = vmatpush1.bf16.msra.mxu0 %v2066_v49  ;;  %2280 = vmatpush1.bf16.msra.mxu1 %v2068_v50 }
 0x655   :  { %2240 = vmatprep.subr.bf16.mxu0 %v2075_v51  ;;  %2281 = vmatprep.subr.bf16.mxu1 %v2077_v52 }
 0x658   :  { %2241 = vmatpush1.bf16.msra.mxu0 %v2074_v53  ;;  %2282 = vmatpush1.bf16.msra.mxu1 %v2076_v56 }
 0x659   :  { %2242 = vmatprep.subr.bf16.mxu0 %v2083_v54  ;;  %2283 = vmatprep.subr.bf16.mxu1 %v2085_v55 }
 0x65c   :  { %2243 = vmatpush1.bf16.msra.mxu0 %v2082_v0  ;;  %2284 = vmatpush1.bf16.msra.mxu1 %v2084_v57 }
 0x65d   :  { %2244 = vmatprep.subr.bf16.mxu0 %v2091_v58  ;;  %2285 = vmatprep.subr.bf16.mxu1 %v2093_v61 }
 0x660   :  { %2245 = vmatpush1.bf16.msra.mxu0 %v2090_v62  ;;  %2286 = vmatpush1.bf16.msra.mxu1 %v2092_v63 }
 0x661   :  { %2246 = vmatprep.subr.bf16.mxu0 %v2099_v17  ;;  %2287 = vmatprep.subr.bf16.mxu1 %v2101_v18 }
 0x664   :  { %2247 = vmatpush1.bf16.msra.mxu0 %v2098_v30  ;;  %2288 = vmatpush1.bf16.msra.mxu1 %v2100_v20 }
 0x665   :  { %2248 = vmatprep.subr.bf16.mxu0 %v2107_v1  ;;  %2289 = vmatprep.subr.bf16.mxu1 %v2109_v2 }
 0x668   :  { %2249 = vmatpush1.bf16.msra.mxu0 %v2106_v21  ;;  %2290 = vmatpush1.bf16.msra.mxu1 %v2108_v3 }
 0x66b   :  { %2267 = vmatmul.mubr.bf16.vlgmr.msra.gmra.mrb[28].mxu0 %v4355_v41  ;;  %2308 = vmatmul.mubr.bf16.vlgmr.msra.gmra.mrb[28].mxu1 %v4355_v41 }
 0x66c   :  { %3524 = shalt.err (!%p3521_p5)
}
 0x66d   :  { %s4472_s18 = sld [smem:[#allocation84_spill]] }
 0x673   :  { %s3525_s19 = scalar_lea.hbm %s4472_s18, 384 }
 0x674   :  { %p3526_p6 = scmp.ne.s32.totalorder %s4472_s18, %s3525_s19  ;;  %p3529_p7 = scmp.lt.u32.totalorder %s3525_s19, %s4472_s18 }
 0x676   :  { %p3531_p8 = pnand %p3529_p7, %p3526_p6 }
 0x678   :  { %3534 = shalt.err (!%p3531_p8)
}
 0x679   :  { %2345 = dma.vmem_to_hbm [thread:$0]  %s2340_s22, 384, %s4472_s18, [#allocation30], %s3597_s2, %s3597_s2, %s3598_s3   ;;  %v2122_v5 = vsub.s32 2, %v4256_v59  ;;  %v2126_v4 = vsub.s32 3, %v4256_v59  ;;  %v2134_v26 = vsub.s32 5, %v4256_v59  ;;  %v2142_v27 = vsub.s32 7, %v4256_v59 }
 0x67a   :  { %s4473_s5 = sld [smem:[#allocation82_spill]]  ;;  %s3630_s2 = smov [#allocation28]  }
 0x67b   :  { %s2330_s3 = sshll.u32 %s3630_s2, 4  ;;  %s2331_s3 = int_to_ptr.vmem [resolvable:$true] %s2330_s3 }
 0x67c   :  { %s3535_s8 = scalar_lea.vmem %s2331_s3, 1024  ;;  %p3540_p10 = scmp.lt.s32.totalorder %s2331_s3, %s2331_s3 }
 0x67d   :  { %p3536_p9 = scmp.ne.s32.totalorder %s2331_s3, %s3535_s8  ;;  %p3541_p11 = scmp.lt.s32.totalorder %s3535_s8, %s3535_s8 }
 0x67f   :  { %p3542_p12 = por %p3541_p11, %p3540_p10 }
 0x680   :  { %v2110_v6 = vld [vmem:[%s4473_s5] sm:$0xff] }
 0x681   :  { %v2115_v7 = vrot.slane %v2110_v6, %v4259_v60  ;;  %v2123_v8 = vrot.slane %v2110_v6, %v2122_v5  ;;  %v2119_v9 = vrot.slane %v2110_v6, %v4267_v19  ;;  %v2127_v35 = vrot.slane %v2110_v6, %v2126_v4  ;;  %p3543_p13 = pnand %p3542_p12, %p3536_p9 }
 0x682   :  { %v2130_v60 = vsub.s32 4, %v4256_v59  ;;  %v2138_v19 = vsub.s32 6, %v4256_v59  ;;  %v2135_v32 = vrot.slane %v2110_v6, %v2134_v26  ;;  %v2143_v34 = vrot.slane %v2110_v6, %v2142_v27 }
 0x684   :  { %v2131_v28 = vrot.slane %v2110_v6, %v2130_v60  ;;  %v2139_v31 = vrot.slane %v2110_v6, %v2138_v19 }
 0x71e   :  { %v2186_v10 = vpop.f32.mrb[24].mxu0  ;;  %v2227_v11 = vpop.f32.mrb[24].mxu1 }
 0x71f   :  { %v2187_v12 = vadd.f32 %v2186_v10, %v2115_v7  ;;  %v2228_v29 = vadd.f32 %v2227_v11, %v2123_v8  ;;  %v2188_v36 = vpop.f32.mrb[25].mxu0  ;;  %v2229_v13 = vpop.f32.mrb[25].mxu1 }
 0x720   :  { %v2189_v14 = vadd.f32 %v2188_v36, %v2119_v9  ;;  %v2230_v15 = vadd.f32 %v2229_v13, %v2127_v35  ;;  %v2190_v16 = vpop.f32.mrb[26].mxu0  ;;  %v2231_v23 = vpop.f32.mrb[26].mxu1 }
 0x721   :  { %2316 = vst [vmem:[#allocation28] sm:$0xff] %v2187_v12  ;;  %2318 = vst [vmem:[#allocation28 + $0x10] sm:$0xff] %v2228_v29  ;;  %v2191_v24 = vpop.f32.mrb[27].mxu0  ;;  %v2232_v25 = vpop.f32.mrb[27].mxu1 }
 0x722   :  { %2317 = vst [vmem:[#allocation28 + $0x8] sm:$0xff] %v2189_v14  ;;  %2319 = vst [vmem:[#allocation28 + $0x18] sm:$0xff] %v2230_v15 }
 0x73e   :  { %v2268_v37 = vpop.f32.mrb[28].mxu0  ;;  %v2309_v39 = vpop.f32.mrb[28].mxu1 }
 0x73f   :  { %v2269_v38 = vadd.f32 %v2268_v37, %v2131_v28  ;;  %v2310_v40 = vadd.f32 %v2309_v39, %v2139_v31  ;;  %v2270_v22 = vpop.f32.mrb[29].mxu0  ;;  %v2311_v41 = vpop.f32.mrb[29].mxu1 }
 0x740   :  { %v2271_v42 = vadd.f32 %v2270_v22, %v2135_v32  ;;  %v2312_v43 = vadd.f32 %v2311_v41, %v2143_v34  ;;  %v2272_v44 = vpop.f32.mrb[30].mxu0  ;;  %v2313_v45 = vpop.f32.mrb[30].mxu1 }
 0x741   :  { %2320 = vst [vmem:[#allocation28 + $0x20] sm:$0xff] %v2269_v38  ;;  %2322 = vst [vmem:[#allocation28 + $0x30] sm:$0xff] %v2310_v40  ;;  %v2273_v59 = vpop.f32.mrb[31].mxu0  ;;  %v2314_v46 = vpop.f32.mrb[31].mxu1 }
 0x742   :  { %2321 = vst [vmem:[#allocation28 + $0x28] sm:$0xff] %v2271_v42  ;;  %2323 = vst [vmem:[#allocation28 + $0x38] sm:$0xff] %v2312_v43 }
 0x743   :  { %3546 = shalt.err (!%p3543_p13)
}
 0x744   :  { %s4474_s13 = sld [smem:[#allocation83_spill]] }
 0x74a   :  { %s3547_s12 = scalar_lea.hbm %s4474_s13, 1024 }
 0x74b   :  { %p3548_p0 = scmp.ne.s32.totalorder %s4474_s13, %s3547_s12  ;;  %p3551_p1 = scmp.lt.u32.totalorder %s3547_s12, %s4474_s13 }
 0x74d   :  { %p3553_p2 = pnand %p3551_p1, %p3548_p0 }
 0x74f   :  { %3556 = shalt.err (!%p3553_p2)
}
 0x750   :  { %2333 = dma.vmem_to_hbm [thread:$0]  %s2331_s3, 1024, %s4474_s13, [#allocation8]  }
 0x751   :  { %3591 = dma.done.wait [#allocation8], 1024  }
 0x752   :  { %3592 = vsyncadd [#allocation8], 4294966272 }
 0x753   :  { %3593 = dma.done.wait [#allocation30], 384  }
 0x754   :  { %3594 = vsyncadd [#allocation30], 4294966912 }
 0x755   :  { %2352 = vsyncpa [#allocation7], 1 }
 0x756   :  { %2353 = vsyncpa [#allocation12], 1 }
 0x757   :  { %2354 = vsyncpa [#allocation15], 1 }
 0x758   :  { %2355 = vsyncpa [#allocation18], 1 }
 0x759   :  { %2356 = vsyncpa [#allocation21], 1 }
 0x75a   :  { %2357 = vsyncpa [#allocation24], 1 }
 0x75b   :  { %2358 = vsyncpa [#allocation27], 1 }
 0x75c   :  { %2359 = vsyncpa [#allocation8], 1 }
 0x75d   :  { %2360 = vsyncpa [#allocation30], 1 }
 0x75e   :  { %2361 = vsyncpa [#allocation9], 1 }
 0x75f   :  { %2362 = vsyncmov [#allocation4] }
 0x762   :  { %s2363_s9 = vpop.sfrf %2362 }
 0x763   :  { %p2612_p3 = scmp.ne.s32.totalorder %s2363_s9, 0 }
 0x765   :  { %2367 = shalt.err (%p2612_p3)  }
 0x766   :  { %2369 = vsyncmov [#allocation4 + $0x1] }
 0x769   :  { %s2370_s30 = vpop.sfrf %2369 }
 0x76a   :  { %p2613_p4 = scmp.ne.s32.totalorder %s2370_s30, 0 }
 0x76c   :  { %2374 = shalt.err (%p2613_p4)  }
 0x76d   :  { %2376 = vsyncmov [#allocation4 + $0x2] }
 0x770   :  { %s2377_s21 = vpop.sfrf %2376 }
 0x771   :  { %p2614_p5 = scmp.ne.s32.totalorder %s2377_s21, 0 }
 0x773   :  { %2381 = shalt.err (%p2614_p5)  }
 0x774   :  { %2383 = vsyncmov [#allocation4 + $0x3] }
 0x777   :  { %s2384_s22 = vpop.sfrf %2383 }
 0x778   :  { %p2615_p6 = scmp.ne.s32.totalorder %s2384_s22, 0 }
 0x77a   :  { %2388 = shalt.err (%p2615_p6)  }
 0x77b   :  { %2390 = vsyncmov [#allocation4 + $0x4] }
 0x77e   :  { %s2391_s16 = vpop.sfrf %2390 }
 0x77f   :  { %p2616_p7 = scmp.ne.s32.totalorder %s2391_s16, 0 }
 0x781   :  { %2395 = shalt.err (%p2616_p7)  }
 0x782   :  { %2397 = vsyncmov [#allocation4 + $0x5] }
 0x785   :  { %s2398_s0 = vpop.sfrf %2397 }
 0x786   :  { %p2617_p8 = scmp.ne.s32.totalorder %s2398_s0, 0 }
 0x788   :  { %2402 = shalt.err (%p2617_p8)  }
 0x789   :  { %2404 = vsyncmov [#allocation4 + $0x6] }
 0x78c   :  { %s2405_s10 = vpop.sfrf %2404 }
 0x78d   :  { %p2618_p9 = scmp.ne.s32.totalorder %s2405_s10, 0 }
 0x78f   :  { %2409 = shalt.err (%p2618_p9)  }
 0x790   :  { %2411 = vsyncmov [#allocation4 + $0x7] }
 0x793   :  { %s2412_s18 = vpop.sfrf %2411 }
 0x794   :  { %p2619_p10 = scmp.ne.s32.totalorder %s2412_s18, 0 }
 0x796   :  { %2416 = shalt.err (%p2619_p10)  }
 0x797   :  { %2417 = vsyncmov [#allocation5] }
 0x79a   :  { %s2418_s19 = vpop.sfrf %2417 }
 0x79b   :  { %p2620_p11 = scmp.ne.s32.totalorder %s2418_s19, 0 }
 0x79d   :  { %2422 = shalt.err (%p2620_p11)  }

</bundles_post_ra>
